<compile_context>
chip_gen: v6e
topology: v6e:2x2x1
jax: 0.10.0
libtpu: 0.0.40
codegen_flags: <defaults>
</compile_context>

<pallas_src>
import math

import jax
import jax.numpy as jnp
from jax.experimental import pallas as pl
from jax.experimental.pallas import tpu as pltpu


# -----------------------------------------------------------------------------
# Exact (erf-based) GELU, matching torch.nn.functional.gelu(approximate='none').
# Abramowitz & Stegun 7.1.26 rational approximation (|err| <= 1.5e-7 ~ f32 eps)
# built only from ops with guaranteed Mosaic lowerings (exp -> EUP, rest -> VPU).
# gelu(0) == 0 exactly, so zero padding commutes with the in-kernel activation.
def _erf(x):
    p = 0.3275911
    a1, a2, a3, a4, a5 = (0.254829592, -0.284496736, 1.421413741,
                          -1.453152027, 1.061405429)
    s = jnp.where(x < 0.0, -1.0, 1.0)
    ax = jnp.abs(x)
    t = 1.0 / (1.0 + p * ax)          # exact divide (keep GELU "exact"-grade)
    poly = ((((a5 * t + a4) * t + a3) * t + a2) * t + a1) * t
    return s * (1.0 - poly * jnp.exp(-ax * ax))


def _gelu_exact(x):
    return 0.5 * x * (1.0 + _erf(x * 0.7071067811865476))


# -----------------------------------------------------------------------------
# Fused block kernel:  gelu -> conv1 -> (+b1) -> gelu -> conv2 -> (+b2) -> (+x).
#
# Flattened-padded-image indexing:  Wp = W + 2;  flat index of padded pixel (r, c)
# is r*Wp + c.  Output pixel (y, x) is indexed by j = y*Wp + x; its 3x3 tap (kh, kw)
# lives at flat index j + kh*Wp + kw, i.e. every tap is a contiguous slice of length
# Lq_pad starting at a small static offset.  Columns with (j % Wp) >= W or j >= H*Wp
# are junk and are re-zeroed (mask) before being reused as conv2's padded input.
def _make_block_kernel(H, W, Lq_pad, c4_in, c4_out):
    Wp = W + 2
    q0 = Wp + 1                                   # flat offset of padded pixel (1, 1)
    prepad = -(-q0 // 128) * 128                  # lane-aligned zero margin around h
    offs = [kh * Wp + kw for kh in range(3) for kw in range(3)]

    def kernel(x_ref, w1_ref, b1_ref, w2_ref, b2_ref, mask_ref, out_ref, hp_ref):
        xr = x_ref[...]                           # (4*Cin, Lf) f32 zero-padded image
        res = xr[:, q0:q0 + Lq_pad]               # residual = pre-activation x

        # GELU once per input pixel (NOT once per tap).
        gx = _gelu_exact(xr).astype(jnp.bfloat16)

        # In-kernel im2col: 9 contiguous lane shifts fused into one K=9*4*Cin matmul.
        taps1 = jnp.concatenate([gx[:, o:o + Lq_pad] for o in offs], axis=0)
        h = jnp.dot(w1_ref[...], taps1, preferred_element_type=jnp.float32)
        # bias + GELU once, then zero the padding/junk columns so h becomes a
        # correctly zero-padded image for conv2.
        h = _gelu_exact(h + b1_ref[...]) * mask_ref[...]

        # Re-create the padded layout in a persistent VMEM scratch using three
        # 128-lane-aligned, lane-dense stores.  Margins are rewritten every grid
        # step (cheap) so the pattern stays correct under megacore ("parallel")
        # grid sharding where neither core is guaranteed to see program_id == 0.
        hp_ref[:, :prepad] = jnp.zeros((c4_out, prepad), jnp.bfloat16)
        hp_ref[:, prepad + Lq_pad:] = jnp.zeros((c4_out, prepad), jnp.bfloat16)
        hp_ref[:, prepad:prepad + Lq_pad] = h.astype(jnp.bfloat16)
        hp = hp_ref[...]

        base = prepad - q0
        taps2 = jnp.concatenate([hp[:, base + o:base + o + Lq_pad] for o in offs],
                                axis=0)
        out = jnp.dot(w2_ref[...], taps2, preferred_element_type=jnp.float32)
        out_ref[...] = (out + b2_ref[...] + res).astype(out_ref.dtype)

    return kernel


# -----------------------------------------------------------------------------
# Clifford kernel construction (get_2d_clifford_kernel) and fusion helpers.
def _clifford_kernel_2d(weight, g):
    """weight: (4, Cout, Cin, kH, kW) per-blade -> big kernel (4*Cout, 4*Cin, kH, kW)."""
    w0, w1, w2, w3 = weight[0], weight[1], weight[2], weight[3]
    g0, g1 = float(g[0]), float(g[1])
    k0 = jnp.concatenate([w0, g0 * w1, g1 * w2, -g0 * g1 * w3], axis=1)
    k1 = jnp.concatenate([w1, w0, -g1 * w3, g1 * w2], axis=1)
    k2 = jnp.concatenate([w2, g0 * w3, w0, -g0 * w1], axis=1)
    k3 = jnp.concatenate([w3, w2, -w1, w0], axis=1)
    return jnp.concatenate([k0, k1, k2, k3], axis=0)


def _fuse_weight(weight, g):
    """(4,Cout,Cin,3,3) -> (4*Cout, 9*4*Cin) bf16, row order = tap-major (t*4Cin+ci)."""
    K = _clifford_kernel_2d(weight, g)            # (4*Cout, 4*Cin, 3, 3)
    co, ci, kh, kw = K.shape
    return jnp.transpose(K, (0, 2, 3, 1)).reshape(co, kh * kw * ci).astype(jnp.bfloat16)


# -----------------------------------------------------------------------------
def clifford_basic_block_2d(params, x, g):
    """Forward of CliffordBasicBlock2d (kernel=3, stride=1, pad=1, norm/rotation=False)."""
    B, C_in, H, W, I = x.shape
    assert I == 4, "2D Clifford algebra has 4 blades"
    C_out = params["conv1"]["weight"].shape[1]
    assert params["conv2"]["weight"].shape[1] == C_out
    assert params["conv2"]["weight"].shape[2] == C_out
    assert C_in == C_out, "residual add requires in_channels == out_channels"
    c4_in, c4_out = 4 * C_in, 4 * C_out

    Wp, Hp = W + 2, H + 2
    Lq = H * Wp                                   # computed output columns per image
    Lq_pad = -(-Lq // 128) * 128                  # lane-dense output width
    o_max = 2 * Wp + 2                            # largest tap shift
    Lf = -(-max(Hp * Wp, o_max + Lq_pad) // 128) * 128
    q0 = Wp + 1
    prepad = -(-q0 // 128) * 128                  # scratch zero margin (lane aligned)

    # (B, C, H, W, I) -> blade-major fused channels (B, 4C, H, W).
    x_big = jnp.transpose(x, (0, 4, 1, 2, 3)).reshape(B, c4_in, H, W)
    # Zero-pad spatially (pad=1), flatten (H+2, W+2) row-major, zero-extend lanes to Lf.
    xp = jnp.pad(x_big, ((0, 0), (0, 0), (1, 1), (1, 1))).reshape(B, c4_in, Hp * Wp)
    xpf = jnp.pad(xp, ((0, 0), (0, 0), (0, Lf - Hp * Wp)))

    w1 = _fuse_weight(params["conv1"]["weight"], g)        # (4Cout, 9*4Cin) bf16
    w2 = _fuse_weight(params["conv2"]["weight"], g)        # (4Cout, 9*4Cout) bf16
    b1 = params["conv1"]["bias"].reshape(c4_out, 1).astype(jnp.float32)
    b2 = params["conv2"]["bias"].reshape(c4_out, 1).astype(jnp.float32)

    # Valid-column mask: j = y*Wp + x with y < H and x < W (computed once, host side).
    j = jnp.arange(Lq_pad)
    mask = ((j < Lq) & ((j % Wp) < W)).astype(jnp.float32).reshape(1, Lq_pad)

    kernel = _make_block_kernel(H, W, Lq_pad, c4_in, c4_out)
    # TODO(synk): for large H*W add a spatial row-tile grid axis (with 1-row halo) and
    # an explicit vmem_limit_bytes so the per-step block stays VMEM-bounded on v7x and
    # both TensorCores get many pipelined steps; at this toy size one block per batch
    # element (a few tens of KiB) is already far below any VMEM limit.
    out_full = pl.pallas_call(
        kernel,
        out_shape=jax.ShapeDtypeStruct((B, c4_out, Lq_pad), jnp.float32),
        grid=(B,),
        in_specs=[
            pl.BlockSpec((None, c4_in, Lf), lambda b: (b, 0, 0)),      # padded image
            pl.BlockSpec((c4_out, 9 * c4_in), lambda b: (0, 0)),       # fused W1 (bf16)
            pl.BlockSpec((c4_out, 1), lambda b: (0, 0)),               # bias1
            pl.BlockSpec((c4_out, 9 * c4_out), lambda b: (0, 0)),      # fused W2 (bf16)
            pl.BlockSpec((c4_out, 1), lambda b: (0, 0)),               # bias2
            pl.BlockSpec((1, Lq_pad), lambda b: (0, 0)),               # valid-col mask
        ],
        out_specs=pl.BlockSpec((None, c4_out, Lq_pad), lambda b: (b, 0, 0)),
        scratch_shapes=[pltpu.VMEM((c4_out, 2 * prepad + Lq_pad), jnp.bfloat16)],
        compiler_params=pltpu.CompilerParams(dimension_semantics=("parallel",)),
    )(xpf, w1, b1, w2, b2, mask)

    # Crop the valid columns (j = y*Wp + x, x < W) and un-fuse the blades.
    out = out_full[:, :, :Lq].reshape(B, c4_out, H, Wp)[:, :, :, :W]
    out = out.reshape(B, 4, C_out, H, W)
    return jnp.transpose(out, (0, 2, 3, 4, 1))             # (B, C_out, H, W, 4)


# -----------------------------------------------------------------------------
# Deterministic parameter init (shapes follow _CliffordConvNd: 4 per-blade weights
# of (Cout, Cin, k, k) and bias of (4, Cout) per conv).
def init_params(key, in_channels, out_channels, kernel_size=3, n_blades=4):
    ks = jax.random.split(key, 4)

    def conv(kw, kb, cin, cout):
        fan_in = n_blades * cin * kernel_size * kernel_size
        scale = 1.0 / math.sqrt(fan_in)
        w = scale * jax.random.normal(
            kw, (n_blades, cout, cin, kernel_size, kernel_size), jnp.float32)
        b = scale * jax.random.normal(kb, (n_blades, cout), jnp.float32)
        return {"weight": w, "bias": b}

    return {"conv1": conv(ks[0], ks[1], in_channels, out_channels),
            "conv2": conv(ks[2], ks[3], out_channels, out_channels)}


# -----------------------------------------------------------------------------
# Pure-JAX reference (lax.conv + exact jax.nn.gelu) for the in-script sanity check.
# Note: the Pallas kernel rounds conv operands to bf16 for the MXU (f32 accumulate);
# the reference uses Precision.HIGHEST f32, hence the loose tolerance below.
def _reference(params, x, g):
    B, C_in, H, W, I = x.shape
    x_big = jnp.transpose(x, (0, 4, 1, 2, 3)).reshape(B, I * C_in, H, W)

    def conv(p, inp):
        K = _clifford_kernel_2d(p["weight"], g)
        y = jax.lax.conv_general_dilated(
            inp, K, window_strides=(1, 1), padding=((1, 1), (1, 1)),
            dimension_numbers=("NCHW", "OIHW", "NCHW"),
            precision=jax.lax.Precision.HIGHEST)
        return y + p["bias"].reshape(1, -1, 1, 1)

    h = conv(params["conv1"], jax.nn.gelu(x_big, approximate=False))
    out_big = conv(params["conv2"], jax.nn.gelu(h, approximate=False)) + x_big
    C_out = params["conv2"]["weight"].shape[1]
    return jnp.transpose(out_big.reshape(B, I, C_out, H, W), (0, 2, 3, 4, 1))


if __name__ == "__main__":
    B, C, H, W = 2, 4, 16, 16            # in_channels == out_channels (residual add)
    G = (1.0, 1.0)                        # Clifford algebra signature g
    key = jax.random.PRNGKey(0)
    kx, kp = jax.random.split(key)
    x = jax.random.normal(kx, (B, C, H, W, 4), jnp.float32)
    params = init_params(kp, C, C)

    fwd = jax.jit(lambda p, v: clifford_basic_block_2d(p, v, G))
    out = jax.block_until_ready(fwd(params, x))
    assert out.shape == (B, C, H, W, 4), out.shape

    ref = _reference(params, x, G)
    err = float(jnp.max(jnp.abs(out - ref)))
    tol = 2e-2 * (1.0 + float(jnp.max(jnp.abs(ref))))   # bf16 MXU operands
    assert err <= tol, f"mismatch vs reference: max abs err {err} > {tol}"
    print("KERNEL_OK")
</pallas_src>

<mosaic_0001>
module attributes {stable_mosaic.version = 11 : i64} {
  func.func @kernel(%arg0: i32, %arg1: memref<1x16x512xf32, #tpu.memory_space<vmem>>, %arg2: memref<16x144xbf16, #tpu.memory_space<vmem>>, %arg3: memref<16x1xf32, #tpu.memory_space<vmem>>, %arg4: memref<16x144xbf16, #tpu.memory_space<vmem>>, %arg5: memref<16x1xf32, #tpu.memory_space<vmem>>, %arg6: memref<1x384xf32, #tpu.memory_space<vmem>>, %arg7: memref<1x16x384xf32, #tpu.memory_space<vmem>>, %arg8: memref<16x640xbf16, #tpu.memory_space<vmem>>) attributes {dimension_semantics = [#tpu.dimension_semantics<parallel>], iteration_bounds = array<i64: 2>, scalar_prefetch = 0 : i64, scratch_operands = 1 : i64, tpu.core_type = #tpu.core_type<tc>, window_params = [{transform_indices = @transform_0, window_bounds = array<i64: 1, 16, 512>}, {pipeline_mode = #tpu.pipeline_mode<synchronous>, transform_indices = @transform_1, window_bounds = array<i64: 16, 144>}, {pipeline_mode = #tpu.pipeline_mode<synchronous>, transform_indices = @transform_2, window_bounds = array<i64: 16, 1>}, {pipeline_mode = #tpu.pipeline_mode<synchronous>, transform_indices = @transform_3, window_bounds = array<i64: 16, 144>}, {pipeline_mode = #tpu.pipeline_mode<synchronous>, transform_indices = @transform_4, window_bounds = array<i64: 16, 1>}, {pipeline_mode = #tpu.pipeline_mode<synchronous>, transform_indices = @transform_5, window_bounds = array<i64: 1, 384>}, {transform_indices = @transform_6, window_bounds = array<i64: 1, 16, 384>}]} {
    %c0 = arith.constant 0 : index
    %c0_0 = arith.constant 0 : index
    %c0_1 = arith.constant 0 : index
    %0 = vector.load %arg1[%c0, %c0_0, %c0_1] : memref<1x16x512xf32, #tpu.memory_space<vmem>>, vector<1x16x512xf32>
    %1 = vector.shape_cast %0 : vector<1x16x512xf32> to vector<16x512xf32>
    %2 = vector.extract_strided_slice %1 {offsets = [0, 19], sizes = [16, 384], strides = [1, 1]} : vector<16x512xf32> to vector<16x384xf32>
    %cst = arith.constant 5.000000e-01 : f32
    %3 = vector.broadcast %cst : f32 to vector<16x512xf32>
    %4 = arith.mulf %3, %1 : vector<16x512xf32>
    %cst_2 = arith.constant 0.707106769 : f32
    %5 = vector.broadcast %cst_2 : f32 to vector<16x512xf32>
    %6 = arith.mulf %1, %5 : vector<16x512xf32>
    %cst_3 = arith.constant 0.000000e+00 : f32
    %7 = vector.broadcast %cst_3 : f32 to vector<16x512xf32>
    %8 = arith.cmpf olt, %6, %7 : vector<16x512xf32>
    %cst_4 = arith.constant -1.000000e+00 : f32
    %cst_5 = arith.constant 1.000000e+00 : f32
    %9 = vector.broadcast %cst_4 : f32 to vector<16x512xf32>
    %10 = vector.broadcast %cst_5 : f32 to vector<16x512xf32>
    %11 = arith.select %8, %9, %10 : vector<16x512xi1>, vector<16x512xf32>
    %12 = math.absf %6 : vector<16x512xf32>
    %cst_6 = arith.constant 0.327591091 : f32
    %13 = vector.broadcast %cst_6 : f32 to vector<16x512xf32>
    %14 = arith.mulf %13, %12 : vector<16x512xf32>
    %cst_7 = arith.constant 1.000000e+00 : f32
    %15 = vector.broadcast %cst_7 : f32 to vector<16x512xf32>
    %16 = arith.addf %15, %14 : vector<16x512xf32>
    %cst_8 = arith.constant 1.000000e+00 : f32
    %17 = vector.broadcast %cst_8 : f32 to vector<16x512xf32>
    %18 = arith.divf %17, %16 : vector<16x512xf32>
    %cst_9 = arith.constant 1.06140542 : f32
    %19 = vector.broadcast %cst_9 : f32 to vector<16x512xf32>
    %20 = arith.mulf %19, %18 : vector<16x512xf32>
    %cst_10 = arith.constant -1.45315206 : f32
    %21 = vector.broadcast %cst_10 : f32 to vector<16x512xf32>
    %22 = arith.addf %20, %21 : vector<16x512xf32>
    %23 = arith.mulf %22, %18 : vector<16x512xf32>
    %cst_11 = arith.constant 1.42141378 : f32
    %24 = vector.broadcast %cst_11 : f32 to vector<16x512xf32>
    %25 = arith.addf %23, %24 : vector<16x512xf32>
    %26 = arith.mulf %25, %18 : vector<16x512xf32>
    %cst_12 = arith.constant -0.284496725 : f32
    %27 = vector.broadcast %cst_12 : f32 to vector<16x512xf32>
    %28 = arith.addf %26, %27 : vector<16x512xf32>
    %29 = arith.mulf %28, %18 : vector<16x512xf32>
    %cst_13 = arith.constant 0.254829586 : f32
    %30 = vector.broadcast %cst_13 : f32 to vector<16x512xf32>
    %31 = arith.addf %29, %30 : vector<16x512xf32>
    %32 = arith.mulf %31, %18 : vector<16x512xf32>
    %cst_14 = arith.constant 0.000000e+00 : f32
    %33 = vector.broadcast %cst_14 : f32 to vector<16x512xf32>
    %34 = arith.subf %33, %12 : vector<16x512xf32>
    %35 = arith.mulf %34, %12 : vector<16x512xf32>
    %36 = math.exp %35 : vector<16x512xf32>
    %37 = arith.mulf %32, %36 : vector<16x512xf32>
    %cst_15 = arith.constant 1.000000e+00 : f32
    %38 = vector.broadcast %cst_15 : f32 to vector<16x512xf32>
    %39 = arith.subf %38, %37 : vector<16x512xf32>
    %40 = arith.mulf %11, %39 : vector<16x512xf32>
    %cst_16 = arith.constant 1.000000e+00 : f32
    %41 = vector.broadcast %cst_16 : f32 to vector<16x512xf32>
    %42 = arith.addf %41, %40 : vector<16x512xf32>
    %43 = arith.mulf %4, %42 : vector<16x512xf32>
    %44 = arith.truncf %43 : vector<16x512xf32> to vector<16x512xbf16>
    %45 = vector.extract_strided_slice %44 {offsets = [0, 0], sizes = [16, 384], strides = [1, 1]} : vector<16x512xbf16> to vector<16x384xbf16>
    %46 = vector.extract_strided_slice %44 {offsets = [0, 1], sizes = [16, 384], strides = [1, 1]} : vector<16x512xbf16> to vector<16x384xbf16>
    %47 = vector.extract_strided_slice %44 {offsets = [0, 2], sizes = [16, 384], strides = [1, 1]} : vector<16x512xbf16> to vector<16x384xbf16>
    %48 = vector.extract_strided_slice %44 {offsets = [0, 18], sizes = [16, 384], strides = [1, 1]} : vector<16x512xbf16> to vector<16x384xbf16>
    %49 = vector.extract_strided_slice %44 {offsets = [0, 19], sizes = [16, 384], strides = [1, 1]} : vector<16x512xbf16> to vector<16x384xbf16>
    %50 = vector.extract_strided_slice %44 {offsets = [0, 20], sizes = [16, 384], strides = [1, 1]} : vector<16x512xbf16> to vector<16x384xbf16>
    %51 = vector.extract_strided_slice %44 {offsets = [0, 36], sizes = [16, 384], strides = [1, 1]} : vector<16x512xbf16> to vector<16x384xbf16>
    %52 = vector.extract_strided_slice %44 {offsets = [0, 37], sizes = [16, 384], strides = [1, 1]} : vector<16x512xbf16> to vector<16x384xbf16>
    %53 = vector.extract_strided_slice %44 {offsets = [0, 38], sizes = [16, 384], strides = [1, 1]} : vector<16x512xbf16> to vector<16x384xbf16>
    %54 = tpu.concatenate %45, %46, %47, %48, %49, %50, %51, %52, %53 in 0 : vector<16x384xbf16>, vector<16x384xbf16>, vector<16x384xbf16>, vector<16x384xbf16>, vector<16x384xbf16>, vector<16x384xbf16>, vector<16x384xbf16>, vector<16x384xbf16>, vector<16x384xbf16> -> vector<144x384xbf16>
    %c0_17 = arith.constant 0 : index
    %c0_18 = arith.constant 0 : index
    %55 = vector.load %arg2[%c0_17, %c0_18] : memref<16x144xbf16, #tpu.memory_space<vmem>>, vector<16x144xbf16>
    %cst_19 = arith.constant dense<0.000000e+00> : vector<16x384xf32>
    %56 = tpu.matmul %55, %54, %cst_19 {dimension_numbers = #tpu.dot_dimension_numbers<[1], [0], [0], [1], [0, 0, 1, 1], [], []>} : vector<16x144xbf16>, vector<144x384xbf16>, vector<16x384xf32> -> vector<16x384xf32>
    %c0_20 = arith.constant 0 : index
    %c0_21 = arith.constant 0 : index
    %57 = vector.load %arg3[%c0_20, %c0_21] : memref<16x1xf32, #tpu.memory_space<vmem>>, vector<16x1xf32>
    %58 = vector.broadcast %57 : vector<16x1xf32> to vector<16x384xf32>
    %59 = arith.addf %56, %58 : vector<16x384xf32>
    %cst_22 = arith.constant 5.000000e-01 : f32
    %60 = vector.broadcast %cst_22 : f32 to vector<16x384xf32>
    %61 = arith.mulf %60, %59 : vector<16x384xf32>
    %cst_23 = arith.constant 0.707106769 : f32
    %62 = vector.broadcast %cst_23 : f32 to vector<16x384xf32>
    %63 = arith.mulf %59, %62 : vector<16x384xf32>
    %cst_24 = arith.constant 0.000000e+00 : f32
    %64 = vector.broadcast %cst_24 : f32 to vector<16x384xf32>
    %65 = arith.cmpf olt, %63, %64 : vector<16x384xf32>
    %cst_25 = arith.constant -1.000000e+00 : f32
    %cst_26 = arith.constant 1.000000e+00 : f32
    %66 = vector.broadcast %cst_25 : f32 to vector<16x384xf32>
    %67 = vector.broadcast %cst_26 : f32 to vector<16x384xf32>
    %68 = arith.select %65, %66, %67 : vector<16x384xi1>, vector<16x384xf32>
    %69 = math.absf %63 : vector<16x384xf32>
    %cst_27 = arith.constant 0.327591091 : f32
    %70 = vector.broadcast %cst_27 : f32 to vector<16x384xf32>
    %71 = arith.mulf %70, %69 : vector<16x384xf32>
    %cst_28 = arith.constant 1.000000e+00 : f32
    %72 = vector.broadcast %cst_28 : f32 to vector<16x384xf32>
    %73 = arith.addf %72, %71 : vector<16x384xf32>
    %cst_29 = arith.constant 1.000000e+00 : f32
    %74 = vector.broadcast %cst_29 : f32 to vector<16x384xf32>
    %75 = arith.divf %74, %73 : vector<16x384xf32>
    %cst_30 = arith.constant 1.06140542 : f32
    %76 = vector.broadcast %cst_30 : f32 to vector<16x384xf32>
    %77 = arith.mulf %76, %75 : vector<16x384xf32>
    %cst_31 = arith.constant -1.45315206 : f32
    %78 = vector.broadcast %cst_31 : f32 to vector<16x384xf32>
    %79 = arith.addf %77, %78 : vector<16x384xf32>
    %80 = arith.mulf %79, %75 : vector<16x384xf32>
    %cst_32 = arith.constant 1.42141378 : f32
    %81 = vector.broadcast %cst_32 : f32 to vector<16x384xf32>
    %82 = arith.addf %80, %81 : vector<16x384xf32>
    %83 = arith.mulf %82, %75 : vector<16x384xf32>
    %cst_33 = arith.constant -0.284496725 : f32
    %84 = vector.broadcast %cst_33 : f32 to vector<16x384xf32>
    %85 = arith.addf %83, %84 : vector<16x384xf32>
    %86 = arith.mulf %85, %75 : vector<16x384xf32>
    %cst_34 = arith.constant 0.254829586 : f32
    %87 = vector.broadcast %cst_34 : f32 to vector<16x384xf32>
    %88 = arith.addf %86, %87 : vector<16x384xf32>
    %89 = arith.mulf %88, %75 : vector<16x384xf32>
    %cst_35 = arith.constant 0.000000e+00 : f32
    %90 = vector.broadcast %cst_35 : f32 to vector<16x384xf32>
    %91 = arith.subf %90, %69 : vector<16x384xf32>
    %92 = arith.mulf %91, %69 : vector<16x384xf32>
    %93 = math.exp %92 : vector<16x384xf32>
    %94 = arith.mulf %89, %93 : vector<16x384xf32>
    %cst_36 = arith.constant 1.000000e+00 : f32
    %95 = vector.broadcast %cst_36 : f32 to vector<16x384xf32>
    %96 = arith.subf %95, %94 : vector<16x384xf32>
    %97 = arith.mulf %68, %96 : vector<16x384xf32>
    %cst_37 = arith.constant 1.000000e+00 : f32
    %98 = vector.broadcast %cst_37 : f32 to vector<16x384xf32>
    %99 = arith.addf %98, %97 : vector<16x384xf32>
    %100 = arith.mulf %61, %99 : vector<16x384xf32>
    %c0_38 = arith.constant 0 : index
    %c0_39 = arith.constant 0 : index
    %101 = vector.load %arg6[%c0_38, %c0_39] : memref<1x384xf32, #tpu.memory_space<vmem>>, vector<1x384xf32>
    %102 = vector.broadcast %101 : vector<1x384xf32> to vector<16x384xf32>
    %103 = arith.mulf %100, %102 : vector<16x384xf32>
    %cst_40 = arith.constant 0.000000e+00 : bf16
    %104 = vector.broadcast %cst_40 : bf16 to vector<16x128xbf16>
    %c0_41 = arith.constant 0 : index
    %c0_42 = arith.constant 0 : index
    %105 = vector.load %arg8[%c0_41, %c0_42] : memref<16x640xbf16, #tpu.memory_space<vmem>>, vector<16x128xbf16>
    tpu.vector_store %arg8[%c0_41, %c0_42], %104 {strides = array<i32>} : memref<16x640xbf16, #tpu.memory_space<vmem>>, vector<16x128xbf16>,
    %cst_43 = arith.constant 0.000000e+00 : bf16
    %106 = vector.broadcast %cst_43 : bf16 to vector<16x128xbf16>
    %c0_44 = arith.constant 0 : index
    %c512 = arith.constant 512 : index
    %107 = vector.load %arg8[%c0_44, %c512] : memref<16x640xbf16, #tpu.memory_space<vmem>>, vector<16x128xbf16>
    tpu.vector_store %arg8[%c0_44, %c512], %106 {strides = array<i32>} : memref<16x640xbf16, #tpu.memory_space<vmem>>, vector<16x128xbf16>,
    %108 = arith.truncf %103 : vector<16x384xf32> to vector<16x384xbf16>
    %c0_45 = arith.constant 0 : index
    %c128 = arith.constant 128 : index
    %109 = vector.load %arg8[%c0_45, %c128] : memref<16x640xbf16, #tpu.memory_space<vmem>>, vector<16x384xbf16>
    tpu.vector_store %arg8[%c0_45, %c128], %108 {strides = array<i32>} : memref<16x640xbf16, #tpu.memory_space<vmem>>, vector<16x384xbf16>,
    %c0_46 = arith.constant 0 : index
    %c0_47 = arith.constant 0 : index
    %110 = vector.load %arg8[%c0_46, %c0_47] : memref<16x640xbf16, #tpu.memory_space<vmem>>, vector<16x640xbf16>
    %111 = vector.extract_strided_slice %110 {offsets = [0, 109], sizes = [16, 384], strides = [1, 1]} : vector<16x640xbf16> to vector<16x384xbf16>
    %112 = vector.extract_strided_slice %110 {offsets = [0, 110], sizes = [16, 384], strides = [1, 1]} : vector<16x640xbf16> to vector<16x384xbf16>
    %113 = vector.extract_strided_slice %110 {offsets = [0, 111], sizes = [16, 384], strides = [1, 1]} : vector<16x640xbf16> to vector<16x384xbf16>
    %114 = vector.extract_strided_slice %110 {offsets = [0, 127], sizes = [16, 384], strides = [1, 1]} : vector<16x640xbf16> to vector<16x384xbf16>
    %115 = vector.extract_strided_slice %110 {offsets = [0, 128], sizes = [16, 384], strides = [1, 1]} : vector<16x640xbf16> to vector<16x384xbf16>
    %116 = vector.extract_strided_slice %110 {offsets = [0, 129], sizes = [16, 384], strides = [1, 1]} : vector<16x640xbf16> to vector<16x384xbf16>
    %117 = vector.extract_strided_slice %110 {offsets = [0, 145], sizes = [16, 384], strides = [1, 1]} : vector<16x640xbf16> to vector<16x384xbf16>
    %118 = vector.extract_strided_slice %110 {offsets = [0, 146], sizes = [16, 384], strides = [1, 1]} : vector<16x640xbf16> to vector<16x384xbf16>
    %119 = vector.extract_strided_slice %110 {offsets = [0, 147], sizes = [16, 384], strides = [1, 1]} : vector<16x640xbf16> to vector<16x384xbf16>
    %120 = tpu.concatenate %111, %112, %113, %114, %115, %116, %117, %118, %119 in 0 : vector<16x384xbf16>, vector<16x384xbf16>, vector<16x384xbf16>, vector<16x384xbf16>, vector<16x384xbf16>, vector<16x384xbf16>, vector<16x384xbf16>, vector<16x384xbf16>, vector<16x384xbf16> -> vector<144x384xbf16>
    %c0_48 = arith.constant 0 : index
    %c0_49 = arith.constant 0 : index
    %121 = vector.load %arg4[%c0_48, %c0_49] : memref<16x144xbf16, #tpu.memory_space<vmem>>, vector<16x144xbf16>
    %cst_50 = arith.constant dense<0.000000e+00> : vector<16x384xf32>
    %122 = tpu.matmul %121, %120, %cst_50 {dimension_numbers = #tpu.dot_dimension_numbers<[1], [0], [0], [1], [0, 0, 1, 1], [], []>} : vector<16x144xbf16>, vector<144x384xbf16>, vector<16x384xf32> -> vector<16x384xf32>
    %c0_51 = arith.constant 0 : index
    %c0_52 = arith.constant 0 : index
    %123 = vector.load %arg5[%c0_51, %c0_52] : memref<16x1xf32, #tpu.memory_space<vmem>>, vector<16x1xf32>
    %124 = vector.broadcast %123 : vector<16x1xf32> to vector<16x384xf32>
    %125 = arith.addf %122, %124 : vector<16x384xf32>
    %126 = arith.addf %125, %2 : vector<16x384xf32>
    %c0_53 = arith.constant 0 : index
    %c0_54 = arith.constant 0 : index
    %c0_55 = arith.constant 0 : index
    %127 = vector.load %arg7[%c0_53, %c0_54, %c0_55] : memref<1x16x384xf32, #tpu.memory_space<vmem>>, vector<1x16x384xf32>
    %128 = vector.shape_cast %127 : vector<1x16x384xf32> to vector<16x384xf32>
    %129 = vector.shape_cast %126 : vector<16x384xf32> to vector<1x16x384xf32>
    tpu.vector_store %arg7[%c0_53, %c0_54, %c0_55], %129 {strides = array<i32>} : memref<1x16x384xf32, #tpu.memory_space<vmem>>, vector<1x16x384xf32>,
    return
  }
  func.func @transform_0(%arg0: i32) -> (i32, i32, i32) {
    %c0_i32 = arith.constant 0 : i32
    %c0_i32_0 = arith.constant 0 : i32
    %c0_i32_1 = arith.constant 0 : i32
    return %arg0, %c0_i32, %c0_i32_0 : i32, i32, i32
  }
  func.func @transform_1(%arg0: i32) -> (i32, i32) {
    %c0_i32 = arith.constant 0 : i32
    %c0_i32_0 = arith.constant 0 : i32
    %c0_i32_1 = arith.constant 0 : i32
    return %c0_i32, %c0_i32_0 : i32, i32
  }
  func.func @transform_2(%arg0: i32) -> (i32, i32) {
    %c0_i32 = arith.constant 0 : i32
    %c0_i32_0 = arith.constant 0 : i32
    %c0_i32_1 = arith.constant 0 : i32
    return %c0_i32, %c0_i32_0 : i32, i32
  }
  func.func @transform_3(%arg0: i32) -> (i32, i32) {
    %c0_i32 = arith.constant 0 : i32
    %c0_i32_0 = arith.constant 0 : i32
    %c0_i32_1 = arith.constant 0 : i32
    return %c0_i32, %c0_i32_0 : i32, i32
  }
  func.func @transform_4(%arg0: i32) -> (i32, i32) {
    %c0_i32 = arith.constant 0 : i32
    %c0_i32_0 = arith.constant 0 : i32
    %c0_i32_1 = arith.constant 0 : i32
    return %c0_i32, %c0_i32_0 : i32, i32
  }
  func.func @transform_5(%arg0: i32) -> (i32, i32) {
    %c0_i32 = arith.constant 0 : i32
    %c0_i32_0 = arith.constant 0 : i32
    %c0_i32_1 = arith.constant 0 : i32
    return %c0_i32, %c0_i32_0 : i32, i32
  }
  func.func @transform_6(%arg0: i32) -> (i32, i32, i32) {
    %c0_i32 = arith.constant 0 : i32
    %c0_i32_0 = arith.constant 0 : i32
    %c0_i32_1 = arith.constant 0 : i32
    return %arg0, %c0_i32, %c0_i32_0 : i32, i32, i32
  }
}

</mosaic_0001>

<bundles_post_ra>
// kernel: _lambda_.1
= control target key start
LH: loop header
LB: loop body
LE: loop exit
PB: predicated region body
PF: predicated region fallthrough
CT: control target
= control target key end

     0   :  { %s1567_s21 = smov 0   ;;  %s2169_s0 = inlined_call_operand.vmem [shape: f32[2,16,512], index: 0, kind: input, shape index: {}]   ;;  %s2170_s1 = inlined_call_operand.vmem [shape: bf16[16,144], index: 1, kind: input, shape index: {}]   ;;  %s2171_s2 = inlined_call_operand.vmem [shape: f32[16,1], index: 2, kind: input, shape index: {}]   ;;  %s2172_s3 = inlined_call_operand.vmem [shape: bf16[16,144], index: 3, kind: input, shape index: {}]   ;;  %s2173_s4 = inlined_call_operand.vmem [shape: f32[16,1], index: 4, kind: input, shape index: {}]   ;;  %s2174_s5 = inlined_call_operand.vmem [shape: f32[1,384], index: 5, kind: input, shape index: {}]   ;;  %s2175_s6 = inlined_call_operand.vmem [shape: f32[2,16,384], index: 6, kind: output, shape index: {}]  }
   0x1 LB: > { %s1382_s22 = sadd.s32 4294967295, %s1519_s21   ;;  %p1386_p0 = scmp.ge.s32.totalorder %s1519_s21, 1  ;;  %s1519_s21 = sphi %s1567_s21, %s16_s21  }
   0x2   : > { %p212_p1 = scmp.lt.s32.totalorder %s1519_s21, 3 }
   0x4   : > { %p213_p2 = pnand %p1386_p0, %p212_p1 }
   0x5   : > { %p242_p3 = scmp.lt.s32.totalorder (!%p213_p2), %s1382_s22, 1  ;;  %s1522_s27 = smov (!%p213_p2), 91  }
   0x6   : > { %216 = sbr.rel (%p213_p2) target bundleno = 1048 (0x418), region = 44  ;;  %s1524_s28 = smov (!%p213_p2), 92  }
   0x7   : > { %s1525_s29 = smov (!%p213_p2), 108   ;;  %s1526_s30 = smov (!%p213_p2), 109  }
   0x8   : > { %s1527_s7 = smov (!%p213_p2), 110   ;;  %s1528_s8 = smov (!%p213_p2), 126  }
   0x9   : > { %s1529_s9 = smov (!%p213_p2), 127   ;;  %s1530_s12 = smov (!%p213_p2), 90  }
   0xb   : > { %s2177_s22 = smov (!%p242_p3, %s1382_s22), 1  ;;  %v1521_v43 = vmov 1.0   ;;  %vm628_vm8 = vcmask 130048   ;;  %vm583_vm9 = vcmask 744448   ;;  %vm568_vm10 = vcmask 752640  }
   0xc   : > { %s1409_s23 = sshll.u32 %s2177_s22, 6  ;;  %vm553_vm11 = vcmask 883712   ;;  %vm538_vm12 = vcmask 891904   ;;  %vm523_vm13 = vcmask 900096   ;;  %vm508_vm14 = vcmask 1031168  }
   0xd   : > { %s1581_s26 = scalar_lea.vmem %s2169_s0, %s1409_s23  ;;  %vm493_vm15 = vcmask 1039360   ;;  %s1531_s23 = smov 19  }
   0xe   : > { %v254_v0 = vld [vmem:[%s1581_s26 + $0x8] sm:$0xff]  ;;  %v253_v2 = vld [vmem:[%s1581_s26] sm:$0xff]  ;;  %v1594_v18 = vld [vmem:[%s1581_s26 + $0x10] sm:$0xff] }
   0xf   : > { %v258_v1 = vld [vmem:[%s1581_s26 + $0x28] sm:$0xff]  ;;  %v270_v3 = vmul.f32 0.70710677, %v254_v0  ;;  %v257_v5 = vld [vmem:[%s1581_s26 + $0x20] sm:$0xff]  ;;  %v1587_v6 = vmul.f32 0.70710677, %v253_v2 }
  0x10   : > { %v274_v4 = vmul.f32 0.70710677, %v258_v1  ;;  %v1589_v9 = vmul.f32 0.70710677, %v257_v5  ;;  %v1597_v19 = vld [vmem:[%s1581_s26 + $0x30] sm:$0xff]  ;;  %v1606_v26 = vld [vmem:[%s1581_s26 + $0x18] sm:$0xff] }
  0x11   : > { %v294_v7 = vand.u32 2147483647, %v270_v3  ;;  %v293_v12 = vand.u32 2147483647, %v1587_v6  ;;  %v1600_v23 = vmul.f32 0.70710677, %v1594_v18 }
  0x12   : > { %v298_v8 = vand.u32 2147483647, %v274_v4  ;;  %v297_v13 = vand.u32 2147483647, %v1589_v9  ;;  %v1603_v24 = vmul.f32 0.70710677, %v1597_v19 }
  0x13   : > { %v302_v10 = vmul.f32 0.3275911, %v294_v7  ;;  %v301_v16 = vmul.f32 0.3275911, %v293_v12  ;;  %v406_v22 = vsub.f32 0.0, %v294_v7  ;;  %v1609_v27 = vld [vmem:[%s1581_s26 + $0x38] sm:$0xff] }
  0x14   : > { %v306_v11 = vmul.f32 0.3275911, %v298_v8  ;;  %v305_v17 = vmul.f32 0.3275911, %v297_v13  ;;  %v410_v25 = vsub.f32 0.0, %v298_v8  ;;  %vm278_vm0 = vcmp.lt.f32.partialorder %v270_v3, 0.0 }
  0x15   : > { %v310_v14 = vadd.f32 1.0, %v302_v10  ;;  %v309_v20 = vadd.f32 1.0, %v301_v16  ;;  %v414_v28 = vmul.f32 %v406_v22, %v294_v7  ;;  %v295_v29 = vand.u32 2147483647, %v1600_v23 }
  0x16   : > { %v314_v15 = vadd.f32 1.0, %v306_v11  ;;  %v313_v21 = vadd.f32 1.0, %v305_v17  ;;  %v299_v30 = vand.u32 2147483647, %v1603_v24  ;;  %v1614_v31 = vmul.f32 0.70710677, %v1606_v26 }
  0x17   : > { %1449 = vrcp.f32 %v310_v14  ;;  %v1617_v32 = vmul.f32 0.70710677, %v1609_v27  ;;  %v418_v33 = vmul.f32 %v410_v25, %v298_v8  ;;  %v405_v34 = vsub.f32 0.0, %v293_v12 }
  0x18   : > { %1451 = vrcp.f32 %v314_v15  ;;  %v303_v35 = vmul.f32 0.3275911, %v295_v29  ;;  %v1619_v36 = vmul.f32 0.5, %v254_v0  ;;  %vm282_vm1 = vcmp.lt.f32.partialorder %v274_v4, 0.0 }
  0x19   : > { %1453 = vrcp.f32 %v309_v20  ;;  %v409_v37 = vsub.f32 0.0, %v297_v13  ;;  %v307_v38 = vmul.f32 0.3275911, %v299_v30  ;;  %v1621_v39 = vmul.f32 0.5, %v258_v1 }
  0x1a   : > { %1455 = vrcp.f32 %v313_v21  ;;  %v423_v40 = vmul.f32 1.442695, %v414_v28  ;;  %v1623_v41 = vmul.f32 0.5, %v253_v2  ;;  %v311_v42 = vadd.f32 1.0, %v303_v35 }
  0x1b   : > { %v1626_v44 = vsel %vm278_vm0, -1.0, %v1521_v43  ;;  %v315_v45 = vadd.f32 1.0, %v307_v38  ;;  %v296_v46 = vand.u32 2147483647, %v1614_v31  ;;  %v300_v47 = vand.u32 2147483647, %v1617_v32 }
  0x1c   : > { %v1631_v48 = vsel %vm282_vm1, -1.0, %v1521_v43  ;;  %v431_v49 = vmul.f32 1.442695, %v418_v33  ;;  %v413_v50 = vmul.f32 %v405_v34, %v293_v12  ;;  %1457 = vrcp.f32 %v311_v42 }
  0x1d   : > { %v417_v52 = vmul.f32 %v409_v37, %v297_v13  ;;  %1459 = vrcp.f32 %v315_v45  ;;  %v304_v53 = vmul.f32 0.3275911, %v296_v46  ;;  %v308_v54 = vmul.f32 0.3275911, %v300_v47 }
  0x1e   : > { %1461 = vpow2.f32 %v423_v40  ;;  %v1638_v57 = vmul.f32 0.5, %v257_v5  ;;  %vm277_vm2 = vcmp.lt.f32.partialorder %v1587_v6, 0.0  ;;  %v407_v59 = vsub.f32 0.0, %v295_v29 }
  0x1f   : > { %v312_v60 = vadd.f32 1.0, %v304_v53  ;;  %v316_v61 = vadd.f32 1.0, %v308_v54  ;;  %1463 = vpow2.f32 %v431_v49  ;;  %v421_v63 = vmul.f32 1.442695, %v413_v50 }
  0x20   : > { %v411_v0 = vsub.f32 0.0, %v299_v30  ;;  %v429_v3 = vmul.f32 1.442695, %v417_v52  ;;  %v408_v4 = vsub.f32 0.0, %v296_v46  ;;  %v412_v10 = vsub.f32 0.0, %v300_v47 }
  0x21   : > { %1465 = vrcp.f32 %v312_v60  ;;  %vm281_vm3 = vcmp.lt.f32.partialorder %v1589_v9, 0.0  ;;  %v415_v13 = vmul.f32 %v407_v59, %v295_v29  ;;  %v1655_v25 = vsel %vm277_vm2, -1.0, %v1521_v43 }
  0x22   : > { %1467 = vrcp.f32 %v316_v61  ;;  %v419_v16 = vmul.f32 %v411_v0, %v299_v30  ;;  %v416_v21 = vmul.f32 %v408_v4, %v296_v46  ;;  %v420_v33 = vmul.f32 %v412_v10, %v300_v47 }
  0x23   : > { %1469 = vpow2.f32 %v421_v63  ;;  %v1662_v30 = vsel %vm281_vm3, -1.0, %v1521_v43  ;;  %v425_v35 = vmul.f32 1.442695, %v415_v13  ;;  %vm279_vm4 = vcmp.lt.f32.partialorder %v1600_v23, 0.0 }
  0x24   : > { %v1633_v51 = vpop.eup %1449  ;;  %1471 = vpow2.f32 %v429_v3  ;;  %v433_v40 = vmul.f32 1.442695, %v419_v16  ;;  %v427_v46 = vmul.f32 1.442695, %v416_v21  ;;  %v435_v52 = vmul.f32 1.442695, %v420_v33 }
  0x25   : > { %v1635_v55 = vpop.eup %1451  ;;  %v334_v56 = vmul.f32 1.0614054, %v1633_v51  ;;  %1473 = vpow2.f32 %v425_v35  ;;  %vm283_vm5 = vcmp.lt.f32.partialorder %v1603_v24, 0.0  ;;  %vm280_vm6 = vcmp.lt.f32.partialorder %v1614_v31, 0.0 }
  0x26   : > { %v338_v58 = vmul.f32 1.0614054, %v1635_v55  ;;  %v1642_v1 = vpop.eup %1453  ;;  %1475 = vpow2.f32 %v433_v40  ;;  %vm284_vm7 = vcmp.lt.f32.partialorder %v1617_v32, 0.0  ;;  %v268_v31 = vmul.f32 0.5, %v1609_v27  ;;  %v607_v27 = vld [vmem:[%s2171_s2] sm:$0xff] }
  0x27   : > { %v342_v62 = vadd.f32 -1.4531521, %v334_v56  ;;  %v1644_v7 = vpop.eup %1455  ;;  %v333_v8 = vmul.f32 1.0614054, %v1642_v1  ;;  %1477 = vpow2.f32 %v427_v46  ;;  %vm598_vm0 = vcmask 736256  }
  0x28   : > { %v346_v2 = vadd.f32 -1.4531521, %v338_v58  ;;  %v337_v12 = vmul.f32 1.0614054, %v1644_v7  ;;  %1479 = vpow2.f32 %v435_v52 }
  0x29   : > { %v350_v5 = vmul.f32 %v1633_v51, %v342_v62  ;;  %v341_v15 = vadd.f32 -1.4531521, %v333_v8  ;;  %v1665_v42 = vpop.eup %1457 }
  0x2a   : > { %v354_v11 = vmul.f32 %v1635_v55, %v346_v2  ;;  %v345_v20 = vadd.f32 -1.4531521, %v337_v12  ;;  %v1667_v49 = vpop.eup %1459  ;;  %v335_v9 = vmul.f32 1.0614054, %v1665_v42 }
  0x2b   : > { %v358_v14 = vadd.f32 1.4214138, %v350_v5  ;;  %v349_v28 = vmul.f32 %v1642_v1, %v341_v15  ;;  %v1462_v53 = vpop.eup %1461  ;;  %v339_v58 = vmul.f32 1.0614054, %v1667_v49 }
  0x2c   : > { %v362_v17 = vadd.f32 1.4214138, %v354_v11  ;;  %v353_v34 = vmul.f32 %v1644_v7, %v345_v20  ;;  %v343_v61 = vadd.f32 -1.4531521, %v335_v9  ;;  %v1464_v62 = vpop.eup %1463 }
  0x2d   : > { %v366_v22 = vmul.f32 %v1633_v51, %v358_v14  ;;  %v357_v38 = vadd.f32 1.4214138, %v349_v28  ;;  %v347_v2 = vadd.f32 -1.4531521, %v339_v58 }
  0x2e   : > { %v370_v29 = vmul.f32 %v1635_v55, %v362_v17  ;;  %v361_v45 = vadd.f32 1.4214138, %v353_v34  ;;  %v1675_v3 = vpop.eup %1465  ;;  %v351_v8 = vmul.f32 %v1665_v42, %v343_v61 }
  0x2f   : > { %v374_v37 = vadd.f32 -0.28449672, %v366_v22  ;;  %v365_v50 = vmul.f32 %v1642_v1, %v357_v38  ;;  %v1680_v10 = vpop.eup %1467  ;;  %v355_v13 = vmul.f32 %v1667_v49, %v347_v2  ;;  %v336_v14 = vmul.f32 1.0614054, %v1675_v3 }
  0x30   : > { %v378_v6 = vadd.f32 -0.28449672, %v370_v29  ;;  %v369_v56 = vmul.f32 %v1644_v7, %v361_v45  ;;  %v359_v17 = vadd.f32 1.4214138, %v351_v8  ;;  %v1470_v20 = vpop.eup %1469 }
  0x31   : > { %v382_v47 = vmul.f32 %v1633_v51, %v374_v37  ;;  %v373_v60 = vadd.f32 -0.28449672, %v365_v50  ;;  %v363_v28 = vadd.f32 1.4214138, %v355_v13  ;;  %v344_v33 = vadd.f32 -1.4531521, %v336_v14  ;;  %v1472_v29 = vpop.eup %1471 }
  0x32   : > { %v386_v54 = vmul.f32 %v1635_v55, %v378_v6  ;;  %v377_v0 = vadd.f32 -0.28449672, %v369_v56  ;;  %v367_v35 = vmul.f32 %v1665_v42, %v359_v17 }
  0x33   : > { %v390_v59 = vadd.f32 0.2548296, %v382_v47  ;;  %v381_v5 = vmul.f32 %v1642_v1, %v373_v60  ;;  %v371_v6 = vmul.f32 %v1667_v49, %v363_v28  ;;  %v352_v45 = vmul.f32 %v1675_v3, %v344_v33 }
  0x34   : > { %v394_v63 = vadd.f32 0.2548296, %v386_v54  ;;  %v385_v12 = vmul.f32 %v1644_v7, %v377_v0  ;;  %v375_v50 = vadd.f32 -0.28449672, %v367_v35  ;;  %v287_v28 = vsel %vm279_vm4, -1.0, %v1521_v43 }
  0x35   : > { %v398_v4 = vmul.f32 %v1633_v51, %v390_v59  ;;  %v389_v16 = vadd.f32 0.2548296, %v381_v5  ;;  %v340_v51 = vmul.f32 1.0614054, %v1680_v10  ;;  %v360_v54 = vadd.f32 1.4214138, %v352_v45 }
  0x36   : > { %v402_v11 = vmul.f32 %v1635_v55, %v394_v63  ;;  %v393_v22 = vadd.f32 0.2548296, %v385_v12  ;;  %v383_v59 = vmul.f32 %v1665_v42, %v375_v50  ;;  %v1474_v63 = vpop.eup %1473 }
  0x37   : > { %v438_v15 = vmul.f32 %v1462_v53, %v398_v4  ;;  %v397_v55 = vmul.f32 %v1642_v1, %v389_v16  ;;  %v348_v37 = vadd.f32 -1.4531521, %v340_v51  ;;  %v379_v53 = vadd.f32 -0.28449672, %v371_v6  ;;  %v1476_v5 = vpop.eup %1475 }
  0x38   : > { %v442_v21 = vmul.f32 %v1464_v62, %v402_v11  ;;  %v401_v40 = vmul.f32 %v1644_v7, %v393_v22  ;;  %v1478_v14 = vpop.eup %1477  ;;  %v1523_v6 = vmov 0  }
  0x39   : > { %v446_v34 = vsub.f32 1.0, %v438_v15  ;;  %v437_v47 = vmul.f32 %v1470_v20, %v397_v55  ;;  %v356_v9 = vmul.f32 %v1680_v10, %v348_v37  ;;  %v387_v62 = vmul.f32 %v1667_v49, %v379_v53  ;;  %675 = vmatprep.subr.bf16.mxu1 %v1523_v6  ;;  %901 = vst [vmem:[#allocation2] sm:$0xf] %v1523_v6 }
  0x3a   : > { %v450_v38 = vsub.f32 1.0, %v442_v21  ;;  %v441_v52 = vmul.f32 %v1472_v29, %v401_v40  ;;  %902 = vst [vmem:[#allocation2 + $0x14] sm:$0xf] %v1523_v6  ;;  %903 = vst [vmem:[#allocation2 + $0x10] sm:$0xf] %v1523_v6  ;;  %1434 = vset.pattern.permute.xlu0 %v1523_v6  ;;  %1435 = vset.pattern.permute.xlu1 %v1523_v6 }
  0x3b   : > { %v454_v46 = vmul.f32 %v446_v34, %v1626_v44  ;;  %v445_v58 = vsub.f32 1.0, %v437_v47  ;;  %v364_v7 = vadd.f32 1.4214138, %v356_v9  ;;  %v368_v44 = vmul.f32 %v1675_v3, %v360_v54  ;;  %904 = vst [vmem:[#allocation2 + $0x24] sm:$0xf] %v1523_v6 }
  0x3c   : > { %v458_v1 = vmul.f32 %v450_v38, %v1631_v48  ;;  %v449_v61 = vsub.f32 1.0, %v441_v52  ;;  %v391_v48 = vadd.f32 0.2548296, %v383_v59  ;;  %v395_v12 = vadd.f32 0.2548296, %v387_v62 }
  0x3d   : > { %v462_v56 = vadd.f32 1.0, %v454_v46  ;;  %v453_v2 = vmul.f32 %v445_v58, %v1655_v25  ;;  %v372_v4 = vmul.f32 %v1680_v10, %v364_v7  ;;  %v376_v13 = vadd.f32 -0.28449672, %v368_v44 }
  0x3e   : > { %v466_v60 = vadd.f32 1.0, %v458_v1  ;;  %v457_v11 = vmul.f32 %v449_v61, %v1662_v30  ;;  %v399_v16 = vmul.f32 %v1665_v42, %v391_v48  ;;  %v403_v20 = vmul.f32 %v1667_v49, %v395_v12  ;;  %v608_v61 = vld [vmem:[%s2171_s2 + $0x8] sm:$0xff] }
  0x3f   : > { %v470_v0 = vmul.f32 %v462_v56, %v1619_v36  ;;  %v461_v15 = vadd.f32 1.0, %v453_v2  ;;  %v380_v17 = vadd.f32 -0.28449672, %v372_v4  ;;  %v1480_v36 = vpop.eup %1479  ;;  %v384_v21 = vmul.f32 %v1675_v3, %v376_v13 }
  0x40   : > { %v474_v8 = vmul.f32 %v466_v60, %v1621_v39  ;;  %v465_v25 = vadd.f32 1.0, %v457_v11  ;;  %v439_v30 = vmul.f32 %v1474_v63, %v399_v16  ;;  %v443_v33 = vmul.f32 %v1476_v5, %v403_v20 }
  0x41   : > { %v469_v39 = vmul.f32 %v461_v15, %v1623_v41  ;;  %v388_v22 = vmul.f32 %v1680_v10, %v380_v17  ;;  %v392_v29 = vadd.f32 0.2548296, %v384_v21  ;;  %v263_v49 = vmul.f32 0.5, %v1594_v18 }
  0x42   : > { %v1706_v51 = vpack.c.bf16 %v474_v8, %v470_v0  ;;  %v473_v42 = vmul.f32 %v465_v25, %v1638_v57  ;;  %v291_v41 = vsel %vm283_vm5, -1.0, %v1521_v43  ;;  %v447_v34 = vsub.f32 1.0, %v439_v30 }
  0x43   : > { %v396_v55 = vadd.f32 0.2548296, %v388_v22  ;;  %v451_v37 = vsub.f32 1.0, %v443_v33  ;;  %v400_v57 = vmul.f32 %v1675_v3, %v392_v29  ;;  %v267_v18 = vmul.f32 0.5, %v1597_v19 }
  0x44   : > { %577 = vrot.lane.b32.xlu0 %v1706_v51, %s1522_s27  ;;  %v1722_v35 = vpack.c.bf16 %v473_v42, %v469_v39  ;;  %v455_v38 = vmul.f32 %v447_v34, %v287_v28  ;;  %v292_v46 = vsel %vm284_vm7, -1.0, %v1521_v43  ;;  %v264_v52 = vmul.f32 0.5, %v1606_v26  ;;  %v1438_v26 = vld [vmem:[%s2170_s1 + $0x4] ss:$8 sps:$4 sm:$0xff]  }
  0x45   : > { %v404_v23 = vmul.f32 %v1680_v10, %v396_v55  ;;  %v459_v24 = vmul.f32 %v451_v37, %v291_v41  ;;  %v440_v40 = vmul.f32 %v1478_v14, %v400_v57  ;;  %v288_v10 = vsel %vm280_vm6, -1.0, %v1521_v43  ;;  %1392 = vmatprep.mubr.msk.bf16.mxu0 %vm628_vm8, %v1438_v26  ;;  %1393 = vmatprep.mubr.msk.bf16.mxu1 %vm628_vm8, %v1438_v26 }
  0x46   : > { %575 = vrot.lane.b32.xlu1 %v1722_v35, %s1522_s27  ;;  %v463_v3 = vadd.f32 1.0, %v455_v38  ;;  %vm1136_vm7 = vcmask 154624  }
  0x47   : > { %v444_v45 = vmul.f32 %v1480_v36, %v404_v23  ;;  %v467_v19 = vadd.f32 1.0, %v459_v24  ;;  %v448_v47 = vsub.f32 1.0, %v440_v40 }
  0x48   : > { %v471_v50 = vmul.f32 %v463_v3, %v263_v49 }
  0x49   : > { %v452_v9 = vsub.f32 1.0, %v444_v45  ;;  %v475_v1 = vmul.f32 %v467_v19, %v267_v18  ;;  %v456_v53 = vmul.f32 %v448_v47, %v288_v10 }
  0x4b   : > { %v460_v54 = vmul.f32 %v452_v9, %v292_v46  ;;  %v1746_v56 = vpack.c.bf16 %v475_v1, %v471_v50  ;;  %v464_v58 = vadd.f32 1.0, %v456_v53 }
  0x4d   : > { %v468_v59 = vadd.f32 1.0, %v460_v54  ;;  %579 = vrot.lane.b32.xlu0 %v1746_v56, %s1522_s27  ;;  %v472_v7 = vmul.f32 %v464_v58, %v264_v52 }
  0x4f   : > { %v476_v32 = vmul.f32 %v468_v59, %v268_v31 }
  0x51   : > { %v480_v60 = vpack.c.bf16 %v476_v32, %v472_v7  ;;  %562 = vrot.lane.b32.xlu0 %v1706_v51, %s1524_s28 }
  0x53   : > { %581 = vrot.lane.b32.xlu1 %v480_v60, %s1522_s27 }
  0x55   : > { %560 = vrot.lane.b32.xlu0 %v1722_v35, %s1524_s28 }
  0x57   : > { %564 = vrot.lane.b32.xlu1 %v1746_v56, %s1524_s28 }
  0x59   : > { %547 = vrot.lane.b32.xlu0 %v1706_v51, %s1525_s29 }
  0x5b   : > { %566 = vrot.lane.b32.xlu1 %v480_v60, %s1524_s28 }
  0x5d   : > { %545 = vrot.lane.b32.xlu0 %v1722_v35, %s1525_s29 }
  0x5f   : > { %549 = vrot.lane.b32.xlu1 %v1746_v56, %s1525_s29 }
  0x61   : > { %532 = vrot.lane.b32.xlu0 %v1706_v51, %s1526_s30 }
  0x63   : > { %551 = vrot.lane.b32.xlu1 %v480_v60, %s1525_s29 }
  0x65   : > { %530 = vrot.lane.b32.xlu0 %v1722_v35, %s1526_s30 }
  0x67   : > { %534 = vrot.lane.b32.xlu1 %v1746_v56, %s1526_s30 }
  0x69   : > { %517 = vrot.lane.b32.xlu0 %v1706_v51, %s1527_s7 }
  0x6b   : > { %536 = vrot.lane.b32.xlu1 %v480_v60, %s1526_s30 }
  0x6d   : > { %515 = vrot.lane.b32.xlu0 %v1722_v35, %s1527_s7 }
  0x6f   : > { %519 = vrot.lane.b32.xlu1 %v1746_v56, %s1527_s7 }
  0x71   : > { %502 = vrot.lane.b32.xlu0 %v1706_v51, %s1528_s8 }
  0x73   : > { %521 = vrot.lane.b32.xlu1 %v480_v60, %s1527_s7 }
  0x75   : > { %500 = vrot.lane.b32.xlu0 %v1722_v35, %s1528_s8 }
  0x77   : > { %504 = vrot.lane.b32.xlu1 %v1746_v56, %s1528_s8 }
  0x79   : > { %487 = vrot.lane.b32.xlu0 %v1706_v51, %s1529_s9 }
  0x7b   : > { %506 = vrot.lane.b32.xlu1 %v480_v60, %s1528_s8 }
  0x7d   : > { %485 = vrot.lane.b32.xlu0 %v1722_v35, %s1529_s9 }
  0x7f   : > { %489 = vrot.lane.b32.xlu1 %v1746_v56, %s1529_s9 }
  0x81   : > { %592 = vrot.lane.b32.xlu0 %v1706_v51, %s1530_s12 }
  0x83   : > { %491 = vrot.lane.b32.xlu1 %v480_v60, %s1529_s9 }
  0x85   : > { %590 = vrot.lane.b32.xlu0 %v1722_v35, %s1530_s12 }
  0x87   : > { %594 = vrot.lane.b32.xlu1 %v1746_v56, %s1530_s12 }
  0x89   : > { %611 = vperm.xlu0 %1434, %v607_v27  }
  0x8b   : > { %596 = vrot.lane.b32.xlu1 %v480_v60, %s1530_s12 }
  0x8f   : > { %616 = vperm.xlu1 %1435, %v608_v61  }
  0xb6   : > { %v578_v62 = vpop.permute.xlu0 %577 }
  0xb8   : > { %v576_v44 = vpop.permute.xlu1 %575 }
  0xb9   : > { %v584_v2 = vsel %vm583_vm9, %v576_v44, %v578_v62 }
  0xbf   : > { %v580_v63 = vpop.permute.xlu0 %579 }
  0xc0   : > { %v585_v0 = vsel %vm583_vm9, %v578_v62, %v580_v63 }
  0xc1   : > { %632 = vmatprep.subr.bf16.mxu0 %v585_v0 }
  0xc2   : > { %633 = vmatpush1.bf16.msra.mxu0 %v584_v2 }
  0xc3   : > { %v563_v48 = vpop.permute.xlu0 %562 }
  0xc5   : > { %v582_v4 = vpop.permute.xlu1 %581 }
  0xc6   : > { %v586_v5 = vsel %vm583_vm9, %v580_v63, %v582_v4 }
  0xc7   : > { %676 = vmatpush1.bf16.msra.mxu1 %v586_v5  ;;  %v561_v8 = vpop.permute.xlu0 %560 }
  0xc8   : > { %677 = vmatprep.subr.bf16.mxu1 %v1523_v6  ;;  %v569_v12 = vsel %vm568_vm10, %v561_v8, %v563_v48 }
  0xc9   : > { %v565_v11 = vpop.permute.xlu1 %564 }
  0xca   : > { %v570_v13 = vsel %vm568_vm10, %v563_v48, %v565_v11 }
  0xcb   : > { %634 = vmatprep.subr.bf16.mxu0 %v570_v13  ;;  %v548_v14 = vpop.permute.xlu0 %547 }
  0xcc   : > { %635 = vmatpush1.bf16.msra.mxu0 %v569_v12 }
  0xcd   : > { %v567_v15 = vpop.permute.xlu1 %566 }
  0xce   : > { %v571_v16 = vsel %vm568_vm10, %v565_v11, %v567_v15 }
  0xcf   : > { %678 = vmatpush1.bf16.msra.mxu1 %v571_v16  ;;  %v546_v17 = vpop.permute.xlu0 %545 }
  0xd0   : > { %679 = vmatprep.subr.bf16.mxu1 %v1523_v6  ;;  %v554_v25 = vsel %vm553_vm11, %v546_v17, %v548_v14 }
  0xd1   : > { %v550_v36 = vpop.permute.xlu1 %549 }
  0xd2   : > { %v555_v20 = vsel %vm553_vm11, %v548_v14, %v550_v36 }
  0xd3   : > { %636 = vmatprep.subr.bf16.mxu0 %v555_v20  ;;  %v533_v21 = vpop.permute.xlu0 %532 }
  0xd4   : > { %637 = vmatpush1.bf16.msra.mxu0 %v554_v25 }
  0xd5   : > { %v552_v39 = vpop.permute.xlu1 %551 }
  0xd6   : > { %v556_v30 = vsel %vm553_vm11, %v550_v36, %v552_v39 }
  0xd7   : > { %680 = vmatpush1.bf16.msra.mxu1 %v556_v30  ;;  %v531_v22 = vpop.permute.xlu0 %530 }
  0xd8   : > { %681 = vmatprep.subr.bf16.mxu1 %v1523_v6  ;;  %v539_v28 = vsel %vm538_vm12, %v531_v22, %v533_v21 }
  0xd9   : > { %v535_v42 = vpop.permute.xlu1 %534 }
  0xda   : > { %v540_v33 = vsel %vm538_vm12, %v533_v21, %v535_v42 }
  0xdb   : > { %638 = vmatprep.subr.bf16.mxu0 %v540_v33  ;;  %v518_v29 = vpop.permute.xlu0 %517 }
  0xdc   : > { %639 = vmatpush1.bf16.msra.mxu0 %v539_v28 }
  0xdd   : > { %v537_v49 = vpop.permute.xlu1 %536 }
  0xde   : > { %v541_v41 = vsel %vm538_vm12, %v535_v42, %v537_v49 }
  0xdf   : > { %682 = vmatpush1.bf16.msra.mxu1 %v541_v41  ;;  %v516_v34 = vpop.permute.xlu0 %515 }
  0xe0   : > { %683 = vmatprep.subr.bf16.mxu1 %v1523_v6  ;;  %v524_v37 = vsel %vm523_vm13, %v516_v34, %v518_v29 }
  0xe1   : > { %v520_v55 = vpop.permute.xlu1 %519 }
  0xe2   : > { %v525_v57 = vsel %vm523_vm13, %v518_v29, %v520_v55 }
  0xe3   : > { %640 = vmatprep.subr.bf16.mxu0 %v525_v57  ;;  %v503_v38 = vpop.permute.xlu0 %502 }
  0xe4   : > { %641 = vmatpush1.bf16.msra.mxu0 %v524_v37 }
  0xe5   : > { %v522_v23 = vpop.permute.xlu1 %521 }
  0xe6   : > { %v526_v18 = vsel %vm523_vm13, %v520_v55, %v522_v23 }
  0xe7   : > { %684 = vmatpush1.bf16.msra.mxu1 %v526_v18  ;;  %v501_v24 = vpop.permute.xlu0 %500 }
  0xe8   : > { %685 = vmatprep.subr.bf16.mxu1 %v1523_v6  ;;  %v509_v3 = vsel %vm508_vm14, %v501_v24, %v503_v38 }
  0xe9   : > { %v505_v40 = vpop.permute.xlu1 %504 }
  0xea   : > { %v510_v10 = vsel %vm508_vm14, %v503_v38, %v505_v40 }
  0xeb   : > { %642 = vmatprep.subr.bf16.mxu0 %v510_v10  ;;  %v488_v45 = vpop.permute.xlu0 %487 }
  0xec   : > { %643 = vmatpush1.bf16.msra.mxu0 %v509_v3 }
  0xed   : > { %v507_v19 = vpop.permute.xlu1 %506 }
  0xee   : > { %v511_v46 = vsel %vm508_vm14, %v505_v40, %v507_v19  ;;  %v880_v19 = vlaneseq }
  0xef   : > { %686 = vmatpush1.bf16.msra.mxu1 %v511_v46  ;;  %v486_v47 = vpop.permute.xlu0 %485 }
  0xf0   : > { %687 = vmatprep.subr.bf16.mxu1 %v1523_v6  ;;  %v494_v9 = vsel %vm493_vm15, %v486_v47, %v488_v45 }
  0xf1   : > { %v490_v50 = vpop.permute.xlu1 %489 }
  0xf2   : > { %v495_v1 = vsel %vm493_vm15, %v488_v45, %v490_v50 }
  0xf3   : > { %644 = vmatprep.subr.bf16.mxu0 %v495_v1  ;;  %v593_v52 = vpop.permute.xlu0 %592 }
  0xf4   : > { %645 = vmatpush1.bf16.msra.mxu0 %v494_v9 }
  0xf5   : > { %v492_v53 = vpop.permute.xlu1 %491  ;;  %646 = vmatprep.subr.bf16.mxu0 %v1706_v51  ;;  %v1436_v51 = vld [vmem:[%s2170_s1] ss:$8 sps:$4 sm:$0xff]  }
  0xf6   : > { %v496_v31 = vsel %vm493_vm15, %v490_v50, %v492_v53 }
  0xf7   : > { %688 = vmatpush1.bf16.msra.mxu1 %v496_v31  ;;  %v591_v54 = vpop.permute.xlu0 %590 }
  0xf8   : > { %689 = vmatprep.subr.bf16.mxu1 %v1523_v6  ;;  %647 = vmatpush1.bf16.msra.mxu0 %v1722_v35  ;;  %v599_v59 = vsel %vm598_vm0, %v591_v54, %v593_v52  ;;  %v1439_v35 = vld [vmem:[#allocation2 + $0x10] ss:$20 sps:$4 sm:$0xff]   ;;  %v1894_v54 = vshrl.u32 %v880_v19, 7 }
  0xf9   : > { %v595_v58 = vpop.permute.xlu1 %594  ;;  %1025 = vrot.lane.b32.xlu0 %v1439_v35, %s1522_s27  ;;  %1036 = vrot.lane.b32.xlu1 %v1439_v35, %s1530_s12 }
  0xfa   : > { %v600_v7 = vsel %vm598_vm0, %v593_v52, %v595_v58 }
  0xfb   : > { %690 = vmatpush1.bf16.msra.mxu1 %v1746_v56  ;;  %662 = vmatprep.subr.bf16.mxu0 %v600_v7 }
  0xfc   : > { %705 = vmatprep.subr.bf16.mxu1 %v1523_v6  ;;  %663 = vmatpush2.bf16.msra.mxu0 %v599_v59 }
  0xfd   : > { %v597_v32 = vpop.permute.xlu1 %596  ;;  %1014 = vrot.lane.b32.xlu0 %v1439_v35, %s1524_s28 }
  0xfe   : > { %v601_v60 = vsel %vm598_vm0, %v595_v58, %v597_v32 }
  0xff   : > { %706 = vmatpush2.bf16.msra.mxu1 %v601_v60  ;;  %665 = vmatmul.mubr.bf16.vlgmr.msra.gmra.mxu0 %v1436_v51 }
 0x100   : > { %1237 = vmatprep.subr.bf16.mxu1 %v1523_v6 }
 0x101   : > { %1003 = vrot.lane.b32.xlu0 %v1439_v35, %s1525_s29 }
 0x102   : > { %708 = vmatmul.mubr.bf16.vlgmr.msra.gmra.mxu1 %v1436_v51 }
 0x104   : > { %v612_v56 = vpop.permute.xlu0 %611 }
 0x10a   : > { %v617_v2 = vpop.permute.xlu1 %616 }
 0x1bf   : > { %v666_v26 = vpop.f32.mrf.mxu0 }
 0x1c0   : > { %v1854_v27 = vadd.f32 %v666_v26, %v612_v56 }
 0x1c1   : > { %v668_v61 = vpop.f32.mrf.mxu0 }
 0x1c2   : > { %v1857_v62 = vmul.f32 0.70710677, %v1854_v27  ;;  %v709_v44 = vpop.f32.mrf.mxu1  ;;  %v1859_v63 = vadd.f32 %v668_v61, %v612_v56 }
 0x1c3   : > { %v1861_v0 = vadd.f32 %v709_v44, %v612_v56  ;;  %v670_v8 = vpop.f32.mrf.mxu0 }
 0x1c4   : > { %v740_v48 = vand.u32 2147483647, %v1857_v62  ;;  %v1865_v4 = vmul.f32 0.70710677, %v1859_v63  ;;  %v711_v5 = vpop.f32.mrf.mxu1  ;;  %v1872_v16 = vadd.f32 %v670_v8, %v617_v2  ;;  %vm728_vm1 = vcmp.lt.f32.partialorder %v1857_v62, 0.0 }
 0x1c5   : > { %v1868_v11 = vmul.f32 0.70710677, %v1861_v0  ;;  %v672_v39 = vpop.f32.mrf.mxu0 }
 0x1c6   : > { %v746_v12 = vmul.f32 0.3275911, %v740_v48  ;;  %v741_v13 = vand.u32 2147483647, %v1865_v4  ;;  %v712_v14 = vpop.f32.mrf.mxu1  ;;  %v1877_v42 = vmul.f32 0.70710677, %v1872_v16  ;;  %v1882_v33 = vadd.f32 %v672_v39, %v617_v2 }
 0x1c7   : > { %v742_v15 = vand.u32 2147483647, %v1868_v11  ;;  %v1874_v25 = vadd.f32 %v712_v14, %v617_v2  ;;  %v824_v41 = vsub.f32 0.0, %v740_v48  ;;  %v882_v2 = vsub.s32 0, %v1894_v54 }
 0x1c8   : > { %v752_v17 = vadd.f32 1.0, %v746_v12  ;;  %v747_v36 = vmul.f32 0.3275911, %v741_v13  ;;  %v714_v20 = vpop.f32.mrf.mxu1  ;;  %v743_v29 = vand.u32 2147483647, %v1877_v42  ;;  %v825_v40 = vsub.f32 0.0, %v741_v13 }
 0x1c9   : > { %v748_v21 = vmul.f32 0.3275911, %v742_v15  ;;  %v1880_v28 = vmul.f32 0.70710677, %v1874_v25  ;;  %v1887_v55 = vmul.f32 0.70710677, %v1882_v33  ;;  %v830_v24 = vmul.f32 %v824_v41, %v740_v48 }
 0x1ca   : > { %1481 = vrcp.f32 %v752_v17  ;;  %v753_v30 = vadd.f32 1.0, %v747_v36  ;;  %v749_v34 = vmul.f32 0.3275911, %v743_v29  ;;  %v826_v23 = vsub.f32 0.0, %v742_v15  ;;  %v878_v12 = vld [vmem:[%s2174_s5] sm:$0x7] }
 0x1cb   : > { %v754_v22 = vadd.f32 1.0, %v748_v21  ;;  %v745_v49 = vand.u32 2147483647, %v1880_v28  ;;  %v744_v38 = vand.u32 2147483647, %v1887_v55  ;;  %v831_v9 = vmul.f32 %v825_v40, %v741_v13 }
 0x1cc   : > { %v755_v57 = vadd.f32 1.0, %v749_v34  ;;  %v832_v46 = vmul.f32 %v826_v23, %v742_v15  ;;  %v836_v50 = vmul.f32 1.442695, %v830_v24  ;;  %v827_v1 = vsub.f32 0.0, %v743_v29 }
 0x1cd   : > { %1483 = vrcp.f32 %v754_v22  ;;  %v751_v37 = vmul.f32 0.3275911, %v745_v49  ;;  %v750_v3 = vmul.f32 0.3275911, %v744_v38  ;;  %v829_v7 = vsub.f32 0.0, %v745_v49 }
 0x1ce   : > { %1485 = vrcp.f32 %v753_v30  ;;  %v840_v59 = vmul.f32 1.442695, %v832_v46  ;;  %v838_v60 = vmul.f32 1.442695, %v831_v9  ;;  %v833_v56 = vmul.f32 %v827_v1, %v743_v29 }
 0x1cf   : > { %v757_v18 = vadd.f32 1.0, %v751_v37  ;;  %1487 = vrcp.f32 %v755_v57  ;;  %v756_v10 = vadd.f32 1.0, %v750_v3  ;;  %v828_v26 = vsub.f32 0.0, %v744_v38 }
 0x1d0   : > { %v835_v5 = vmul.f32 %v829_v7, %v745_v49  ;;  %v890_v13 = vsub.s32 2, %v1894_v54  ;;  %v842_v36 = vmul.f32 1.442695, %v833_v56  ;;  %v1910_v29 = vrot.slane %v878_v12, %v882_v2 }
 0x1d1   : > { %1489 = vrcp.f32 %v757_v18  ;;  %v834_v20 = vmul.f32 %v828_v26, %v744_v38  ;;  %v886_v9 = vsub.s32 1, %v1894_v54  ;;  %vm730_vm2 = vcmp.lt.f32.partialorder %v1868_v11, 0.0 }
 0x1d2   : > { %1491 = vrcp.f32 %v756_v10  ;;  %v846_v34 = vmul.f32 1.442695, %v835_v5  ;;  %v1914_v57 = vrot.slane %v878_v12, %v890_v13  ;;  %vm729_vm3 = vcmp.lt.f32.partialorder %v1865_v4, 0.0 }
 0x1d3   : > { %1493 = vpow2.f32 %v836_v50  ;;  %v844_v3 = vmul.f32 1.442695, %v834_v20  ;;  %vm731_vm4 = vcmp.lt.f32.partialorder %v1877_v42, 0.0  ;;  %vm733_vm5 = vcmp.lt.f32.partialorder %v1880_v28, 0.0 }
 0x1d4   : > { %1495 = vpow2.f32 %v840_v59  ;;  %v739_v28 = vsel %vm733_vm5, -1.0, %v1521_v43  ;;  %vm732_vm6 = vcmp.lt.f32.partialorder %v1887_v55, 0.0  ;;  %v719_v55 = vmul.f32 0.5, %v1872_v16 }
 0x1d5   : > { %1497 = vpow2.f32 %v838_v60 }
 0x1d6   : > { %1499 = vpow2.f32 %v842_v36 }
 0x1d7   : > { %v1482_v45 = vpop.eup %1481  ;;  %1501 = vpow2.f32 %v846_v34 }
 0x1d8   : > { %v770_v47 = vmul.f32 1.0614054, %v1482_v45  ;;  %1503 = vpow2.f32 %v844_v3 }
 0x1da   : > { %v1890_v52 = vpop.eup %1483  ;;  %v776_v53 = vadd.f32 -1.4531521, %v770_v47 }
 0x1db   : > { %v1892_v31 = vpop.eup %1485  ;;  %v772_v58 = vmul.f32 1.0614054, %v1890_v52 }
 0x1dc   : > { %v782_v51 = vmul.f32 %v1482_v45, %v776_v53  ;;  %v771_v32 = vmul.f32 1.0614054, %v1892_v31  ;;  %v1905_v15 = vpop.eup %1487 }
 0x1dd   : > { %v778_v35 = vadd.f32 -1.4531521, %v772_v58  ;;  %v773_v22 = vmul.f32 1.0614054, %v1905_v15 }
 0x1de   : > { %v788_v61 = vadd.f32 1.4214138, %v782_v51  ;;  %v777_v44 = vadd.f32 -1.4531521, %v771_v32  ;;  %v1907_v21 = vpop.eup %1489 }
 0x1df   : > { %v784_v48 = vmul.f32 %v1890_v52, %v778_v35  ;;  %v775_v41 = vmul.f32 1.0614054, %v1907_v21  ;;  %v779_v18 = vadd.f32 -1.4531521, %v773_v22  ;;  %v1917_v38 = vpop.eup %1491  ;;  %v716_v22 = vmul.f32 0.5, %v1854_v27 }
 0x1e0   : > { %v794_v8 = vmul.f32 %v1482_v45, %v788_v61  ;;  %v783_v14 = vmul.f32 %v1892_v31, %v777_v44  ;;  %v774_v47 = vmul.f32 1.0614054, %v1917_v38  ;;  %v1494_v51 = vpop.eup %1493  ;;  %v1930_v61 = vrot.slane %v878_v12, %v886_v9 }
 0x1e1   : > { %v790_v17 = vadd.f32 1.4214138, %v784_v48  ;;  %v781_v40 = vadd.f32 -1.4531521, %v775_v41  ;;  %v785_v46 = vmul.f32 %v1905_v15, %v779_v18  ;;  %v1496_v2 = vpop.eup %1495 }
 0x1e2   : > { %v800_v39 = vadd.f32 -0.28449672, %v794_v8  ;;  %v789_v30 = vadd.f32 1.4214138, %v783_v14  ;;  %v780_v7 = vadd.f32 -1.4531521, %v774_v47  ;;  %v1498_v14 = vpop.eup %1497 }
 0x1e3   : > { %v796_v49 = vmul.f32 %v1890_v52, %v790_v17  ;;  %v787_v1 = vmul.f32 %v1907_v21, %v781_v40  ;;  %v791_v59 = vadd.f32 1.4214138, %v785_v46  ;;  %v734_v17 = vsel %vm728_vm1, -1.0, %v1521_v43  ;;  %v1500_v27 = vpop.eup %1499 }
 0x1e4   : > { %v806_v37 = vmul.f32 %v1482_v45, %v800_v39  ;;  %v795_v23 = vmul.f32 %v1892_v31, %v789_v30  ;;  %v786_v54 = vmul.f32 %v1917_v38, %v780_v7  ;;  %v735_v40 = vsel %vm729_vm3, -1.0, %v1521_v43 }
 0x1e5   : > { %v802_v24 = vadd.f32 -0.28449672, %v796_v49  ;;  %v793_v60 = vadd.f32 1.4214138, %v787_v1  ;;  %v797_v26 = vmul.f32 %v1905_v15, %v791_v59 }
 0x1e6   : > { %v812_v10 = vadd.f32 0.2548296, %v806_v37  ;;  %v801_v19 = vadd.f32 -0.28449672, %v795_v23  ;;  %v792_v13 = vadd.f32 1.4214138, %v786_v54 }
 0x1e7   : > { %v808_v50 = vmul.f32 %v1890_v52, %v802_v24  ;;  %v799_v44 = vmul.f32 %v1907_v21, %v793_v60  ;;  %v803_v8 = vadd.f32 -0.28449672, %v797_v26  ;;  %v717_v24 = vmul.f32 0.5, %v1859_v63 }
 0x1e8   : > { %v818_v53 = vmul.f32 %v1482_v45, %v812_v10  ;;  %v807_v58 = vmul.f32 %v1892_v31, %v801_v19  ;;  %v798_v30 = vmul.f32 %v1917_v38, %v792_v13  ;;  %v718_v10 = vmul.f32 0.5, %v1861_v0 }
 0x1e9   : > { %v814_v32 = vadd.f32 0.2548296, %v808_v50  ;;  %v805_v20 = vadd.f32 -0.28449672, %v799_v44  ;;  %v809_v39 = vmul.f32 %v1905_v15, %v803_v8  ;;  %v1502_v50 = vpop.eup %1501  ;;  %v738_v8 = vsel %vm732_vm6, -1.0, %v1521_v43 }
 0x1ea   : > { %v848_v35 = vmul.f32 %v1494_v51, %v818_v53  ;;  %v813_v56 = vadd.f32 0.2548296, %v807_v58  ;;  %v804_v23 = vadd.f32 -0.28449672, %v798_v30  ;;  %v1504_v0 = vpop.eup %1503 }
 0x1eb   : > { %v820_v45 = vmul.f32 %v1890_v52, %v814_v32  ;;  %v811_v62 = vmul.f32 %v1907_v21, %v805_v20  ;;  %v815_v37 = vadd.f32 0.2548296, %v809_v39 }
 0x1ec   : > { %v854_v48 = vsub.f32 1.0, %v848_v35  ;;  %v819_v5 = vmul.f32 %v1892_v31, %v813_v56  ;;  %v736_v31 = vsel %vm730_vm2, -1.0, %v1521_v43  ;;  %v810_v46 = vmul.f32 %v1917_v38, %v804_v23 }
 0x1ed   : > { %v850_v36 = vmul.f32 %v1496_v2, %v820_v45  ;;  %v817_v3 = vadd.f32 0.2548296, %v811_v62  ;;  %v821_v19 = vmul.f32 %v1905_v15, %v815_v37  ;;  %v737_v15 = vsel %vm731_vm4, -1.0, %v1521_v43 }
 0x1ee   : > { %v860_v52 = vmul.f32 %v854_v48, %v734_v17  ;;  %v849_v12 = vmul.f32 %v1498_v14, %v819_v5  ;;  %v816_v53 = vadd.f32 0.2548296, %v810_v46 }
 0x1ef   : > { %v856_v49 = vsub.f32 1.0, %v850_v36  ;;  %v823_v63 = vmul.f32 %v1907_v21, %v817_v3  ;;  %v851_v1 = vmul.f32 %v1500_v27, %v821_v19  ;;  %v720_v36 = vmul.f32 0.5, %v1882_v33  ;;  %v1445_v33 = vld [vmem:[#allocation2] ss:$20 sps:$4 sm:$0xff]  }
 0x1f0   : > { %v866_v41 = vadd.f32 1.0, %v860_v52  ;;  %v855_v34 = vsub.f32 1.0, %v849_v12  ;;  %v822_v32 = vmul.f32 %v1917_v38, %v816_v53  ;;  %v721_v38 = vmul.f32 0.5, %v1874_v25 }
 0x1f1   : > { %v862_v18 = vmul.f32 %v856_v49, %v736_v31  ;;  %v853_v59 = vmul.f32 %v1502_v50, %v823_v63  ;;  %v857_v51 = vsub.f32 1.0, %v851_v1  ;;  %v2011_v49 = vpop.permute.xlu1 %1036 }
 0x1f2   : > { %v861_v11 = vmul.f32 %v855_v34, %v735_v40  ;;  %v872_v9 = vmul.f32 %v866_v41, %v716_v22  ;;  %v852_v26 = vmul.f32 %v1504_v0, %v822_v32 }
 0x1f3   : > { %v868_v47 = vadd.f32 1.0, %v862_v18  ;;  %v859_v60 = vsub.f32 1.0, %v853_v59  ;;  %v863_v56 = vmul.f32 %v857_v51, %v737_v15 }
 0x1f4   : > { %v867_v4 = vadd.f32 1.0, %v861_v11  ;;  %v895_v21 = vmul.f32 %v1910_v29, %v872_v9  ;;  %v858_v48 = vsub.f32 1.0, %v852_v26 }
 0x1f5   : > { %v874_v58 = vmul.f32 %v868_v47, %v718_v10  ;;  %v865_v45 = vmul.f32 %v859_v60, %v739_v28  ;;  %v869_v2 = vadd.f32 1.0, %v863_v56 }
 0x1f6   : > { %v873_v7 = vmul.f32 %v867_v4, %v717_v24  ;;  %v864_v13 = vmul.f32 %v858_v48, %v738_v8 }
 0x1f7   : > { %v897_v42 = vmul.f32 %v1914_v57, %v874_v58  ;;  %v871_v5 = vadd.f32 1.0, %v865_v45  ;;  %v875_v17 = vmul.f32 %v869_v2, %v719_v55 }
 0x1f8   : > { %v896_v35 = vmul.f32 %v1930_v61, %v873_v7  ;;  %v870_v20 = vadd.f32 1.0, %v864_v13 }
 0x1f9   : > { %v1411_v54 = vpack.c.bf16 %v897_v42, %v897_v42  ;;  %v877_v14 = vmul.f32 %v871_v5, %v721_v38  ;;  %v898_v30 = vmul.f32 %v1910_v29, %v875_v17  ;;  %v1026_v29 = vpop.permute.xlu0 %1025 }
 0x1fa   : > { %v1410_v44 = vpack.c.bf16 %v896_v35, %v895_v21  ;;  %v876_v12 = vmul.f32 %v870_v20, %v720_v36  ;;  %v1446_v36 = vld [vmem:[%s2172_s3 + $0x4] ss:$8 sps:$4 sm:$0xff]  }
 0x1fb   : > { %926 = vst [vmem:[#allocation2 + $0xc] sm:$0xf] %v1411_v54  ;;  %v900_v52 = vmul.f32 %v1914_v57, %v877_v14  ;;  %v1043_v14 = vld [vmem:[%s2173_s4] sm:$0xff]  ;;  %1405 = vmatprep.mubr.msk.bf16.mxu0 %vm628_vm8, %v1446_v36  ;;  %1406 = vmatprep.mubr.msk.bf16.mxu1 %vm628_vm8, %v1446_v36 }
 0x1fc   : > { %925 = vst [vmem:[#allocation2 + $0x4] sm:$0xff] %v1410_v44  ;;  %v899_v25 = vmul.f32 %v1930_v61, %v876_v12  ;;  %v1506_v12 = vld [vmem:[%s1581_s26 + $0x10] sm:$0xff] }
 0x1fd   : > { %v1413_v39 = vpack.c.bf16 %v900_v52, %v900_v52  ;;  %v1015_v57 = vpop.permute.xlu0 %1014  ;;  %v1505_v52 = vld [vmem:[%s1581_s26] sm:$0xff] }
 0x1fe   : > { %v1412_v22 = vpack.c.bf16 %v899_v25, %v898_v30  ;;  %v1507_v25 = vld [vmem:[%s1581_s26 + $0x20] sm:$0xff] }
 0x1ff   : > { %928 = vst [vmem:[#allocation2 + $0x20] sm:$0xf] %v1413_v39 }
 0x200   : > { %927 = vst [vmem:[#allocation2 + $0x18] sm:$0xff] %v1412_v22 }
 0x201   : > { %v2009_v61 = vpop.permute.xlu0 %1003 }
 0x206   : > { %v1971_v16 = vld [vmem:[#allocation2 + $0xc] ss:$20 sps:$4 sm:$0xff]  }
 0x207   : > { %v1440_v43 = vld [vmem:[#allocation2 + $0x8] ss:$20 sps:$4 sm:$0xff]   ;;  %v1442_v31 = vld [vmem:[#allocation2 + $0x4] ss:$20 sps:$4 sm:$0xff]  }
 0x208   : > { %1021 = vrot.lane.b32.xlu0 %v1440_v43, %s1522_s27  ;;  %1019 = vrot.lane.b32.xlu1 %v1442_v31, %s1522_s27 }
 0x20c   : > { %1010 = vrot.lane.b32.xlu0 %v1440_v43, %s1524_s28  ;;  %1023 = vrot.lane.b32.xlu1 %v1971_v16, %s1522_s27 }
 0x210   : > { %999 = vrot.lane.b32.xlu0 %v1440_v43, %s1525_s29  ;;  %1008 = vrot.lane.b32.xlu1 %v1442_v31, %s1524_s28 }
 0x214   : > { %986 = vrot.lane.b32.xlu0 %v1440_v43, %s1526_s30  ;;  %1012 = vrot.lane.b32.xlu1 %v1971_v16, %s1524_s28 }
 0x218   : > { %975 = vrot.lane.b32.xlu0 %v1442_v31, %s1527_s7  ;;  %997 = vrot.lane.b32.xlu1 %v1442_v31, %s1525_s29 }
 0x21c   : > { %979 = vrot.lane.b32.xlu0 %v1971_v16, %s1527_s7  ;;  %1001 = vrot.lane.b32.xlu1 %v1971_v16, %s1525_s29 }
 0x220   : > { %964 = vrot.lane.b32.xlu0 %v1442_v31, %s1528_s8  ;;  %984 = vrot.lane.b32.xlu1 %v1442_v31, %s1526_s30 }
 0x224   : > { %968 = vrot.lane.b32.xlu0 %v1971_v16, %s1528_s8  ;;  %988 = vrot.lane.b32.xlu1 %v1971_v16, %s1526_s30 }
 0x228   : > { %953 = vrot.lane.b32.xlu0 %v1442_v31, %s1529_s9  ;;  %977 = vrot.lane.b32.xlu1 %v1440_v43, %s1527_s7 }
 0x22c   : > { %957 = vrot.lane.b32.xlu0 %v1971_v16, %s1529_s9  ;;  %973 = vrot.lane.b32.xlu1 %v1445_v33, %s1527_s7 }
 0x230   : > { %1030 = vrot.lane.b32.xlu0 %v1442_v31, %s1530_s12  ;;  %966 = vrot.lane.b32.xlu1 %v1440_v43, %s1528_s8 }
 0x234   : > { %1034 = vrot.lane.b32.xlu0 %v1971_v16, %s1530_s12  ;;  %962 = vrot.lane.b32.xlu1 %v1445_v33, %s1528_s8  ;;  %s1414_s8 = smul.u32 48, %s2177_s22 }
 0x236   : > { %s2153_s11 = scalar_lea.vmem %s2175_s6, %s1414_s8 }
 0x238   : > { %1066 = vrot.lane.b32.xlu0 %v1442_v31, %s1531_s23  ;;  %955 = vrot.lane.b32.xlu1 %v1440_v43, %s1529_s9  ;;  %v1044_v31 = vld [vmem:[%s2173_s4 + $0x8] sm:$0xff] }
 0x23c   : > { %1064 = vrot.lane.b32.xlu0 %v1445_v33, %s1531_s23  ;;  %951 = vrot.lane.b32.xlu1 %v1445_v33, %s1529_s9  ;;  %v1510_v33 = vld [vmem:[%s1581_s26 + $0x18] sm:$0xff] }
 0x240   : > { %1032 = vrot.lane.b32.xlu1 %v1440_v43, %s1530_s12 }
 0x244   : > { %1068 = vrot.lane.b32.xlu1 %v1440_v43, %s1531_s23  ;;  %v1508_v43 = vld [vmem:[%s1581_s26 + $0x30] sm:$0xff] }
 0x27a   : > { %v1022_v62 = vpop.permute.xlu0 %1021  ;;  %v1020_v41 = vpop.permute.xlu1 %1019 }
 0x27b   : > { %1120 = vrot.lane.b32.xlu0 %v1020_v41, %s1531_s23  ;;  %v1027_v50 = vsel %vm583_vm9, %v1020_v41, %v1022_v62 }
 0x27e   : > { %v1011_v34 = vpop.permute.xlu0 %1010  ;;  %v1024_v37 = vpop.permute.xlu1 %1023 }
 0x27f   : > { %v1028_v15 = vsel %vm583_vm9, %v1022_v62, %v1024_v37  ;;  %v1029_v42 = vsel %vm583_vm9, %v1024_v37, %v1026_v29  ;;  %v1511_v29 = vld [vmem:[%s1581_s26 + $0x28] sm:$0xff] }
 0x282   : > { %v1000_v23 = vpop.permute.xlu0 %999  ;;  %v1009_v18 = vpop.permute.xlu1 %1008 }
 0x283   : > { %1112 = vrot.lane.b32.xlu0 %v1009_v18, %s1531_s23  ;;  %v1016_v4 = vsel %vm568_vm10, %v1009_v18, %v1011_v34 }
 0x286   : > { %v987_v24 = vpop.permute.xlu0 %986  ;;  %v1013_v40 = vpop.permute.xlu1 %1012 }
 0x287   : > { %v1017_v60 = vsel %vm568_vm10, %v1011_v34, %v1013_v40  ;;  %v1018_v56 = vsel %vm568_vm10, %v1013_v40, %v1015_v57  ;;  %v1512_v57 = vld [vmem:[%s1581_s26 + $0x38] sm:$0xff] }
 0x28a   : > { %v976_v3 = vpop.permute.xlu0 %975  ;;  %v998_v27 = vpop.permute.xlu1 %997 }
 0x28b   : > { %1104 = vrot.lane.b32.xlu0 %v998_v27, %s1531_s23  ;;  %v1005_v58 = vsel %vm553_vm11, %v998_v27, %v1000_v23 }
 0x28e   : > { %v980_v10 = vpop.permute.xlu0 %979  ;;  %v1002_v11 = vpop.permute.xlu1 %1001 }
 0x28f   : > { %v1006_v45 = vsel %vm553_vm11, %v1000_v23, %v1002_v11  ;;  %v1007_v2 = vsel %vm553_vm11, %v1002_v11, %v2009_v61 }
 0x292   : > { %v965_v19 = vpop.permute.xlu0 %964  ;;  %v985_v46 = vpop.permute.xlu1 %984 }
 0x293   : > { %1096 = vrot.lane.b32.xlu0 %v985_v46, %s1531_s23  ;;  %v990_v0 = vsel %vm538_vm12, %v985_v46, %v987_v24 }
 0x296   : > { %v969_v47 = vpop.permute.xlu0 %968  ;;  %v989_v63 = vpop.permute.xlu1 %988 }
 0x297   : > { %1122 = vrot.lane.b32.xlu0 %v1027_v50, %s1531_s23  ;;  %1102 = vrot.lane.b32.xlu1 %v989_v63, %s1531_s23  ;;  %v991_v8 = vsel %vm538_vm12, %v987_v24, %v989_v63 }
 0x29a   : > { %v978_v9 = vpop.permute.xlu1 %977  ;;  %v954_v1 = vpop.permute.xlu0 %953 }
 0x29b   : > { %1114 = vrot.lane.b32.xlu0 %v1016_v4, %s1531_s23  ;;  %1094 = vrot.lane.b32.xlu1 %v980_v10, %s1531_s23  ;;  %v982_v51 = vsel %vm523_vm13, %v976_v3, %v978_v9  ;;  %v983_v13 = vsel %vm523_vm13, %v978_v9, %v980_v10 }
 0x29e   : > { %v974_v53 = vpop.permute.xlu1 %973  ;;  %v958_v59 = vpop.permute.xlu0 %957 }
 0x29f   : > { %1106 = vrot.lane.b32.xlu0 %v1005_v58, %s1531_s23  ;;  %1086 = vrot.lane.b32.xlu1 %v969_v47, %s1531_s23  ;;  %v981_v28 = vsel %vm523_vm13, %v974_v53, %v976_v3 }
 0x2a2   : > { %v967_v7 = vpop.permute.xlu1 %966  ;;  %v1031_v5 = vpop.permute.xlu0 %1030 }
 0x2a3   : > { %1098 = vrot.lane.b32.xlu0 %v990_v0, %s1531_s23  ;;  %1078 = vrot.lane.b32.xlu1 %v958_v59, %s1531_s23  ;;  %v971_v21 = vsel %vm508_vm14, %v965_v19, %v967_v7  ;;  %v972_v17 = vsel %vm508_vm14, %v967_v7, %v969_v47 }
 0x2a6   : > { %v963_v32 = vpop.permute.xlu1 %962  ;;  %v1035_v39 = vpop.permute.xlu0 %1034 }
 0x2a7   : > { %1124 = vrot.lane.b32.xlu1 %v1028_v15, %s1531_s23  ;;  %1090 = vrot.lane.b32.xlu0 %v982_v51, %s1531_s23  ;;  %v970_v26 = vsel %vm508_vm14, %v963_v32, %v965_v19  ;;  %v1040_v22 = vsel %vm598_vm0, %v1035_v39, %v2011_v49 }
 0x2aa   : > { %v956_v35 = vpop.permute.xlu1 %955  ;;  %v2099_v61 = vpop.permute.xlu0 %1066 }
 0x2ab   : > { %1126 = vrot.lane.b32.xlu1 %v1029_v42, %s1531_s23  ;;  %1088 = vrot.lane.b32.xlu0 %v981_v28, %s1531_s23  ;;  %v960_v44 = vsel %vm493_vm15, %v954_v1, %v956_v35  ;;  %v961_v20 = vsel %vm493_vm15, %v956_v35, %v958_v59 }
 0x2ae   : > { %v952_v54 = vpop.permute.xlu1 %951  ;;  %v2101_v49 = vpop.permute.xlu0 %1064 }
 0x2af   : > { %1116 = vrot.lane.b32.xlu1 %v1017_v60, %s1531_s23  ;;  %1082 = vrot.lane.b32.xlu0 %v971_v21, %s1531_s23  ;;  %v959_v48 = vsel %vm493_vm15, %v952_v54, %v954_v1 }
 0x2b2   : > { %v1033_v38 = vpop.permute.xlu1 %1032 }
 0x2b3   : > { %1118 = vrot.lane.b32.xlu1 %v1018_v56, %s1531_s23  ;;  %1080 = vrot.lane.b32.xlu0 %v970_v26, %s1531_s23  ;;  %v1038_v55 = vsel %vm598_vm0, %v1031_v5, %v1033_v38  ;;  %v1039_v30 = vsel %vm598_vm0, %v1033_v38, %v1035_v39 }
 0x2b6   : > { %v2103_v37 = vpop.permute.xlu1 %1068 }
 0x2b7   : > { %1108 = vrot.lane.b32.xlu1 %v1006_v45, %s1531_s23  ;;  %1074 = vrot.lane.b32.xlu0 %v960_v44, %s1531_s23  ;;  %v1138_v39 = vsel %vm1136_vm7, %v2099_v61, %v2103_v37 }
 0x2bb   : > { %1110 = vrot.lane.b32.xlu1 %v1007_v2, %s1531_s23  ;;  %1072 = vrot.lane.b32.xlu0 %v959_v48, %s1531_s23 }
 0x2bf   : > { %1100 = vrot.lane.b32.xlu1 %v991_v8, %s1531_s23  ;;  %1130 = vrot.lane.b32.xlu0 %v1038_v55, %s1531_s23 }
 0x2c3   : > { %1092 = vrot.lane.b32.xlu1 %v983_v13, %s1531_s23  ;;  %1128 = vrot.lane.b32.xlu0 %v1031_v5, %s1531_s23 }
 0x2c7   : > { %1084 = vrot.lane.b32.xlu1 %v972_v17, %s1531_s23  ;;  %1047 = vperm.xlu0 %1434, %v1043_v14  }
 0x2cb   : > { %1076 = vrot.lane.b32.xlu1 %v961_v20, %s1531_s23  ;;  %1286 = vrot.lane.b32.xlu0 %v1505_v52, %s1526_s30 }
 0x2cf   : > { %1070 = vrot.lane.b32.xlu1 %v1971_v16, %s1531_s23  ;;  %1290 = vrot.lane.b32.xlu0 %v1506_v12, %s1526_s30  ;;  %v1509_v16 = vld [vmem:[%s1581_s26 + $0x8] sm:$0xff] }
 0x2d3   : > { %1132 = vrot.lane.b32.xlu1 %v1039_v30, %s1531_s23  ;;  %1294 = vrot.lane.b32.xlu0 %v1507_v25, %s1526_s30 }
 0x2d7   : > { %1134 = vrot.lane.b32.xlu1 %v1040_v22, %s1531_s23  ;;  %1298 = vrot.lane.b32.xlu0 %v1508_v43, %s1526_s30  ;;  %v1137_v22 = vsel %vm1136_vm7, %v2101_v49, %v2099_v61 }
 0x2db   : > { %1052 = vperm.xlu1 %1435, %v1044_v31  }
 0x2df   : > { %1288 = vrot.lane.b32.xlu1 %v1509_v16, %s1526_s30 }
 0x2e3   : > { %1292 = vrot.lane.b32.xlu1 %v1510_v33, %s1526_s30 }
 0x2e7   : > { %1296 = vrot.lane.b32.xlu1 %v1511_v29, %s1526_s30  ;;  %v1448_v29 = vld [vmem:[%s2172_s3] ss:$8 sps:$4 sm:$0xff]  }
 0x2eb   : > { %1300 = vrot.lane.b32.xlu1 %v1512_v57, %s1526_s30 }
 0x2ed   : > { %v1121_v62 = vpop.permute.xlu0 %1120 }
 0x2f5   : > { %v1113_v41 = vpop.permute.xlu0 %1112 }
 0x2fd   : > { %v1105_v34 = vpop.permute.xlu0 %1104 }
 0x305   : > { %v1097_v23 = vpop.permute.xlu0 %1096 }
 0x309   : > { %v1123_v18 = vpop.permute.xlu0 %1122  ;;  %v1103_v24 = vpop.permute.xlu1 %1102 }
 0x30a   : > { %v1158_v50 = vsel %vm1136_vm7, %v1121_v62, %v1123_v18 }
 0x30d   : > { %v1115_v40 = vpop.permute.xlu0 %1114  ;;  %v1095_v3 = vpop.permute.xlu1 %1094 }
 0x30e   : > { %v1155_v59 = vsel %vm1136_vm7, %v1113_v41, %v1115_v40 }
 0x311   : > { %v1107_v27 = vpop.permute.xlu0 %1106  ;;  %v1087_v10 = vpop.permute.xlu1 %1086 }
 0x312   : > { %v1152_v42 = vsel %vm1136_vm7, %v1105_v34, %v1107_v27 }
 0x315   : > { %v1099_v11 = vpop.permute.xlu0 %1098  ;;  %v1079_v19 = vpop.permute.xlu1 %1078 }
 0x316   : > { %v1149_v45 = vsel %vm1136_vm7, %v1097_v23, %v1099_v11 }
 0x319   : > { %v1125_v46 = vpop.permute.xlu1 %1124  ;;  %v1091_v47 = vpop.permute.xlu0 %1090 }
 0x31a   : > { %v1159_v63 = vsel %vm1136_vm7, %v1123_v18, %v1125_v46 }
 0x31b   : > { %1194 = vmatprep.subr.bf16.mxu0 %v1159_v63 }
 0x31c   : > { %1195 = vmatpush1.bf16.msra.mxu0 %v1158_v50 }
 0x31d   : > { %v1127_v9 = vpop.permute.xlu1 %1126  ;;  %v1089_v1 = vpop.permute.xlu0 %1088 }
 0x31e   : > { %v1160_v4 = vsel %vm1136_vm7, %v1125_v46, %v1127_v9  ;;  %v1146_v38 = vsel %vm1136_vm7, %v1089_v1, %v1091_v47 }
 0x31f   : > { %1238 = vmatpush1.bf16.msra.mxu1 %v1160_v4 }
 0x320   : > { %1239 = vmatprep.subr.bf16.mxu1 %v1523_v6 }
 0x321   : > { %v1117_v53 = vpop.permute.xlu1 %1116  ;;  %v1083_v7 = vpop.permute.xlu0 %1082 }
 0x322   : > { %v1156_v58 = vsel %vm1136_vm7, %v1115_v40, %v1117_v53 }
 0x323   : > { %1196 = vmatprep.subr.bf16.mxu0 %v1156_v58 }
 0x324   : > { %1197 = vmatpush1.bf16.msra.mxu0 %v1155_v59 }
 0x325   : > { %v1119_v0 = vpop.permute.xlu1 %1118  ;;  %v1081_v28 = vpop.permute.xlu0 %1080 }
 0x326   : > { %v1157_v15 = vsel %vm1136_vm7, %v1117_v53, %v1119_v0  ;;  %v1143_v14 = vsel %vm1136_vm7, %v1081_v28, %v1083_v7 }
 0x327   : > { %1240 = vmatpush1.bf16.msra.mxu1 %v1157_v15 }
 0x328   : > { %1241 = vmatprep.subr.bf16.mxu1 %v1523_v6 }
 0x329   : > { %v1109_v51 = vpop.permute.xlu1 %1108  ;;  %v1075_v56 = vpop.permute.xlu0 %1074 }
 0x32a   : > { %v1153_v32 = vsel %vm1136_vm7, %v1107_v27, %v1109_v51 }
 0x32b   : > { %1198 = vmatprep.subr.bf16.mxu0 %v1153_v32 }
 0x32c   : > { %1199 = vmatpush1.bf16.msra.mxu0 %v1152_v42 }
 0x32d   : > { %v1111_v60 = vpop.permute.xlu1 %1110  ;;  %v1073_v5 = vpop.permute.xlu0 %1072 }
 0x32e   : > { %v1154_v21 = vsel %vm1136_vm7, %v1109_v51, %v1111_v60  ;;  %v1140_v12 = vsel %vm1136_vm7, %v1073_v5, %v1075_v56 }
 0x32f   : > { %1242 = vmatpush1.bf16.msra.mxu1 %v1154_v21 }
 0x330   : > { %1243 = vmatprep.subr.bf16.mxu1 %v1523_v6 }
 0x331   : > { %v1101_v35 = vpop.permute.xlu1 %1100  ;;  %v1131_v36 = vpop.permute.xlu0 %1130 }
 0x332   : > { %v1151_v26 = vsel %vm1136_vm7, %v1101_v35, %v1103_v24  ;;  %v1150_v54 = vsel %vm1136_vm7, %v1099_v11, %v1101_v35 }
 0x333   : > { %1200 = vmatprep.subr.bf16.mxu0 %v1150_v54  ;;  %1244 = vmatpush1.bf16.msra.mxu1 %v1151_v26 }
 0x334   : > { %1201 = vmatpush1.bf16.msra.mxu0 %v1149_v45  ;;  %1245 = vmatprep.subr.bf16.mxu1 %v1523_v6 }
 0x335   : > { %v1093_v44 = vpop.permute.xlu1 %1092  ;;  %v1129_v43 = vpop.permute.xlu0 %1128 }
 0x336   : > { %v1148_v2 = vsel %vm1136_vm7, %v1093_v44, %v1095_v3  ;;  %v1147_v48 = vsel %vm1136_vm7, %v1091_v47, %v1093_v44  ;;  %v1161_v33 = vsel %vm1136_vm7, %v1129_v43, %v1131_v36 }
 0x337   : > { %1202 = vmatprep.subr.bf16.mxu0 %v1147_v48  ;;  %1246 = vmatpush1.bf16.msra.mxu1 %v1148_v2 }
 0x338   : > { %1203 = vmatpush1.bf16.msra.mxu0 %v1146_v38  ;;  %1247 = vmatprep.subr.bf16.mxu1 %v1523_v6 }
 0x339   : > { %v1085_v8 = vpop.permute.xlu1 %1084 }
 0x33a   : > { %v1145_v55 = vsel %vm1136_vm7, %v1085_v8, %v1087_v10  ;;  %v1144_v13 = vsel %vm1136_vm7, %v1083_v7, %v1085_v8 }
 0x33b   : > { %1204 = vmatprep.subr.bf16.mxu0 %v1144_v13  ;;  %1248 = vmatpush1.bf16.msra.mxu1 %v1145_v55 }
 0x33c   : > { %1205 = vmatpush1.bf16.msra.mxu0 %v1143_v14  ;;  %1249 = vmatprep.subr.bf16.mxu1 %v1523_v6 }
 0x33d   : > { %v1077_v17 = vpop.permute.xlu1 %1076 }
 0x33e   : > { %v1142_v20 = vsel %vm1136_vm7, %v1077_v17, %v1079_v19  ;;  %v1141_v52 = vsel %vm1136_vm7, %v1075_v56, %v1077_v17 }
 0x33f   : > { %1206 = vmatprep.subr.bf16.mxu0 %v1141_v52  ;;  %1250 = vmatpush1.bf16.msra.mxu1 %v1142_v20 }
 0x340   : > { %1207 = vmatpush1.bf16.msra.mxu0 %v1140_v12  ;;  %1251 = vmatprep.subr.bf16.mxu1 %v1523_v6 }
 0x341   : > { %1208 = vmatprep.subr.bf16.mxu0 %v1138_v39  ;;  %v1071_v30 = vpop.permute.xlu1 %1070 }
 0x342   : > { %v1139_v25 = vsel %vm1136_vm7, %v2103_v37, %v1071_v30 }
 0x343   : > { %1252 = vmatpush1.bf16.msra.mxu1 %v1139_v25 }
 0x344   : > { %1209 = vmatpush1.bf16.msra.mxu0 %v1137_v22  ;;  %1267 = vmatprep.subr.bf16.mxu1 %v1523_v6  ;;  %v1048_v6 = vpop.permute.xlu0 %1047 }
 0x345   : > { %v1133_v31 = vpop.permute.xlu1 %1132 }
 0x346   : > { %v1162_v16 = vsel %vm1136_vm7, %v1131_v36, %v1133_v31 }
 0x347   : > { %1224 = vmatprep.subr.bf16.mxu0 %v1162_v16 }
 0x348   : > { %1225 = vmatpush2.bf16.msra.mxu0 %v1161_v33  ;;  %v1287_v41 = vpop.permute.xlu0 %1286 }
 0x349   : > { %v1135_v57 = vpop.permute.xlu1 %1134 }
 0x34a   : > { %v1163_v61 = vsel %vm1136_vm7, %v1133_v31, %v1135_v57 }
 0x34b   : > { %1227 = vmatmul.mubr.bf16.vlgmr.msra.gmra.mxu0 %v1448_v29  ;;  %1268 = vmatpush2.bf16.msra.mxu1 %v1163_v61 }
 0x34c   : > { %v1291_v37 = vpop.permute.xlu0 %1290 }
 0x34e   : > { %1270 = vmatmul.mubr.bf16.vlgmr.msra.gmra.mxu1 %v1448_v29 }
 0x350   : > { %v1295_v18 = vpop.permute.xlu0 %1294 }
 0x354   : > { %v1299_v53 = vpop.permute.xlu0 %1298 }
 0x356   : > { %v1053_v49 = vpop.permute.xlu1 %1052 }
 0x35a   : > { %v1289_v62 = vpop.permute.xlu1 %1288 }
 0x35b   : > { %v1303_v3 = vsel %vm538_vm12, %v1287_v41, %v1289_v62  ;;  %v1304_v46 = vsel %vm538_vm12, %v1289_v62, %v1291_v37 }
 0x35e   : > { %v1293_v34 = vpop.permute.xlu1 %1292 }
 0x35f   : > { %v1305_v4 = vsel %vm538_vm12, %v1291_v37, %v1293_v34 }
 0x362   : > { %v1297_v23 = vpop.permute.xlu1 %1296 }
 0x363   : > { %v1306_v50 = vsel %vm538_vm12, %v1295_v18, %v1297_v23  ;;  %v1307_v28 = vsel %vm538_vm12, %v1297_v23, %v1299_v53 }
 0x366   : > { %v1301_v9 = vpop.permute.xlu1 %1300 }
 0x367   : > { %v1308_v42 = vsel %vm538_vm12, %v1299_v53, %v1301_v9 }
 0x40b   : > { %v1228_v24 = vpop.f32.mrf.mxu0 }
 0x40c   : > { %v1229_v40 = vadd.f32 %v1228_v24, %v1048_v6 }
 0x40d   : > { %v1230_v27 = vpop.f32.mrf.mxu0 }
 0x40e   : > { %v1315_v10 = vadd.f32 %v1303_v3, %v1229_v40  ;;  %v1231_v11 = vadd.f32 %v1230_v27, %v1048_v6  ;;  %v1271_v19 = vpop.f32.mrf.mxu1 }
 0x40f   : > { %v1272_v47 = vadd.f32 %v1271_v19, %v1048_v6  ;;  %v1232_v63 = vpop.f32.mrf.mxu0 }
 0x410   : > { %1321 = vst [vmem:[%s2153_s11] sm:$0xff] %v1315_v10  ;;  %v1316_v1 = vadd.f32 %v1304_v46, %v1231_v11  ;;  %v1233_v58 = vadd.f32 %v1232_v63, %v1053_v49  ;;  %v1273_v59 = vpop.f32.mrf.mxu1 }
 0x411   : > { %v1317_v0 = vadd.f32 %v1305_v4, %v1272_v47  ;;  %v1234_v7 = vpop.f32.mrf.mxu0 }
 0x412   : > { %1322 = vst [vmem:[%s2153_s11 + $0x8] sm:$0xff] %v1316_v1  ;;  %v1318_v15 = vadd.f32 %v1306_v50, %v1233_v58  ;;  %v1235_v51 = vadd.f32 %v1234_v7, %v1053_v49  ;;  %v1274_v32 = vpop.f32.mrf.mxu1 }
 0x413   : > { %1323 = vst [vmem:[%s2153_s11 + $0x10] sm:$0xff] %v1317_v0  ;;  %v1275_v60 = vadd.f32 %v1274_v32, %v1053_v49 }
 0x414   : > { %1324 = vst [vmem:[%s2153_s11 + $0x18] sm:$0xff] %v1318_v15  ;;  %v1319_v21 = vadd.f32 %v1307_v28, %v1235_v51  ;;  %v1276_v35 = vpop.f32.mrf.mxu1 }
 0x415   : > { %v1320_v56 = vadd.f32 %v1308_v42, %v1275_v60 }
 0x416   : > { %1325 = vst [vmem:[%s2153_s11 + $0x20] sm:$0xff] %v1319_v21 }
 0x417   : > { %1326 = vst [vmem:[%s2153_s11 + $0x28] sm:$0xff] %v1320_v56 }
 0x418 PF: > { %s16_s21 = sadd.s32 1, %s1519_s21  }
 0x419   : > { %p13_p4 = scmp.ge.s32.totalorder %s16_s21, 4  }
 0x41b   :  { %15 = sbr.rel (!%p13_p4) target bundleno = 1 (0x1), region = 74 }

</bundles_post_ra>
